<compile_context>
chip_gen: v7x
topology: tpu7x:2x2x1
jax: 0.10.0
libtpu: 0.0.40
codegen_flags: <defaults>
</compile_context>

<pallas_src>
import numpy as np
import jax
import jax.numpy as jnp
from jax.experimental import pallas as pl
from jax.experimental.pallas import tpu as pltpu


def _silu(z):
    return z * jax.nn.sigmoid(z)


def _round_up(a, b):
    return (a + b - 1) // b * b


def _padded_tile_bytes(shape, itemsize):
    """VMEM footprint of one buffer after (8,128) sublane/lane tile padding."""
    if len(shape) == 1:
        shape = (1,) + tuple(shape)
    lead = 1
    for d in shape[:-2]:
        lead *= int(d)
    return lead * _round_up(int(shape[-2]), 8) * _round_up(int(shape[-1]), 128) * itemsize


def output_pp_kernel(estart_ref, elen_ref,                  # scalar prefetch (SMEM)
                     idx_ref, x_ref, rbf_ref,               # per-E-tile inputs
                     w_rbf_ref, w_up_ref, w_lins_ref, b_lins_ref, w_out_ref,
                     out_ref,                               # [tN, C_pad] bf16
                     acc_ref):                              # [tN, D] f32 scratch
    n = pl.program_id(0)          # node tile       (parallel)
    e = pl.program_id(1)          # edge-window step (arbitrary reduction)
    tN, D = acc_ref.shape
    tE = idx_ref.shape[1]
    n_lo = n * tN

    @pl.when(e == 0)
    def _init():
        acc_ref[...] = jnp.zeros_like(acc_ref)

    # Steps beyond this N-tile's window re-present a clamped (already resident)
    # block: skip the compute so nothing is double-added.
    hit = e < elen_ref[n]

    @pl.when(hit)
    def _scatter():
        # 1) lin_rbf(rbf) * x -> per-edge hidden features [tE, H] (bf16 MXU, f32 acc)
        edge_h = jnp.dot(rbf_ref[...].astype(jnp.bfloat16), w_rbf_ref[...],
                         preferred_element_type=jnp.float32) * x_ref[...]
        # 2) fold lin_up into the scatter: segsum(edge) @ W_up == segsum(edge @ W_up)
        edge_d = jnp.dot(edge_h.astype(jnp.bfloat16), w_up_ref[...],
                         preferred_element_type=jnp.float32)           # [tE, D]
        # 3) tile-local one-hot scatter-add: sublane iota vs (idx - n_lo)
        rel = idx_ref[...] - n_lo                                      # [1, tE]
        onehot = (jax.lax.broadcasted_iota(jnp.int32, (tN, tE), 0) == rel
                  ).astype(jnp.bfloat16)                               # exact 0/1
        acc_ref[...] += jnp.dot(onehot, edge_d.astype(jnp.bfloat16),
                                preferred_element_type=jnp.float32)

    @pl.when(e == pl.num_programs(1) - 1)
    def _finalize():
        # Accumulated node features stay f32; these small matmuls run once per
        # N-tile so f32 MXU passes are negligible and preserve accuracy.
        h = acc_ref[...]
        for l in range(w_lins_ref.shape[0]):
            z = jnp.dot(h, w_lins_ref[l], preferred_element_type=jnp.float32) \
                + b_lins_ref[l]
            h = _silu(z)
        out_ref[...] = jnp.dot(h, w_out_ref[...],
                               preferred_element_type=jnp.float32
                               ).astype(out_ref.dtype)


def output_pp_block(x, rbf, i, num_nodes, params, *, tile_n=128, tile_e=256):
    """x: [E, H] f32, rbf: [E, R] f32, i: [E] int32 destination-node indices."""
    E, H = x.shape
    R = rbf.shape[1]
    D = params["w_up"].shape[1]
    L = params["w_lins"].shape[0]
    C = params["w_out"].shape[1]

    # ---- sort edges by destination node: each N-tile's edges form one window ----
    order = jnp.argsort(i)
    i_s = i[order].astype(jnp.int32)
    x_s = x[order]
    rbf_s = rbf[order]

    # node padding; keep an even #N-tiles (when >1) so v7x's two TCs split evenly
    N_pad = _round_up(max(num_nodes, tile_n), tile_n)
    num_n_tiles = N_pad // tile_n
    if num_n_tiles > 1 and num_n_tiles % 2 == 1:
        num_n_tiles += 1
        N_pad = num_n_tiles * tile_n

    # edge padding; sentinel index N_pad never matches any node and sorts last
    E_pad = _round_up(max(E, tile_e), tile_e)
    if E_pad != E:
        pad = E_pad - E
        i_s = jnp.concatenate([i_s, jnp.full((pad,), N_pad, jnp.int32)])
        x_s = jnp.concatenate([x_s, jnp.zeros((pad, H), x.dtype)])
        rbf_s = jnp.concatenate([rbf_s, jnp.zeros((pad, R), rbf.dtype)])
    num_e_tiles = E_pad // tile_e

    # ---- per-N-tile E-tile windows (drive the index_maps and the e-grid size) ----
    # TODO(synk): the data-dependent e-grid extent makes this wrapper non-jittable
    #             w.r.t. `i`; under jit use the full-size e-grid with the same
    #             clamped index_map instead (DMA still skipped, steps are not).
    i_np = np.asarray(jax.device_get(i_s))
    node_lo = np.arange(num_n_tiles, dtype=np.int64) * tile_n
    starts = np.searchsorted(i_np, node_lo, side="left")
    ends = np.searchsorted(i_np, node_lo + tile_n, side="left")
    tile_start = np.minimum(starts // tile_e, num_e_tiles - 1).astype(np.int32)
    tile_len = np.where(ends > starts,
                        (ends - 1) // tile_e + 1 - starts // tile_e,
                        0).astype(np.int32)
    max_len = max(1, int(tile_len.max()))
    estart = jnp.asarray(tile_start)
    elen = jnp.asarray(tile_len)

    idx2d = i_s.reshape(1, E_pad)

    # lane-dense output: pad out channels to 128 lanes; bf16 writeback
    C_pad = _round_up(C, 128)
    w_out = jnp.zeros((D, C_pad), jnp.float32).at[:, :C].set(params["w_out"])

    # scatter-path weights in bf16 (MXU); post-accumulation MLP weights in f32
    w_rbf = params["w_rbf"].astype(jnp.bfloat16)
    w_up = params["w_up"].astype(jnp.bfloat16)
    w_lins = params["w_lins"].astype(jnp.float32)
    b_lins = params["b_lins"].astype(jnp.float32)

    def edge_block(n, e, estart_ref, elen_ref):
        # clamp the window step to a valid E-tile; clamped repeats reuse the
        # already-resident buffer (no new DMA is issued for the repeat)
        return estart_ref[n] + jnp.minimum(e, jnp.maximum(elen_ref[n] - 1, 0))

    grid_spec = pltpu.PrefetchScalarGridSpec(
        num_scalar_prefetch=2,
        grid=(num_n_tiles, max_len),
        in_specs=[
            pl.BlockSpec((1, tile_e),
                         lambda n, e, es, el: (0, edge_block(n, e, es, el))),    # idx
            pl.BlockSpec((tile_e, H),
                         lambda n, e, es, el: (edge_block(n, e, es, el), 0)),    # x
            pl.BlockSpec((tile_e, R),
                         lambda n, e, es, el: (edge_block(n, e, es, el), 0)),    # rbf
            pl.BlockSpec((R, H), lambda n, e, es, el: (0, 0)),          # w_rbf (resident)
            pl.BlockSpec((H, D), lambda n, e, es, el: (0, 0)),          # w_up
            pl.BlockSpec((L, D, D), lambda n, e, es, el: (0, 0, 0)),    # w_lins
            pl.BlockSpec((L, 1, D), lambda n, e, es, el: (0, 0, 0)),    # b_lins
            pl.BlockSpec((D, C_pad), lambda n, e, es, el: (0, 0)),      # w_out
        ],
        out_specs=pl.BlockSpec((tile_n, C_pad), lambda n, e, es, el: (n, 0)),
        scratch_shapes=[pltpu.VMEM((tile_n, D), jnp.float32)],
    )

    # honest VMEM budget: double-buffered inputs/outputs + scratch + compiler headroom
    buf_bytes = (
        2 * (_padded_tile_bytes((1, tile_e), 4)
             + _padded_tile_bytes((tile_e, H), 4)
             + _padded_tile_bytes((tile_e, R), 4)
             + _padded_tile_bytes((R, H), 2)
             + _padded_tile_bytes((H, D), 2)
             + _padded_tile_bytes((L, D, D), 4)
             + _padded_tile_bytes((L, 1, D), 4)
             + _padded_tile_bytes((D, C_pad), 4)
             + _padded_tile_bytes((tile_n, C_pad), 2))
        + _padded_tile_bytes((tile_n, D), 4))
    vmem_limit = int(min(2 * buf_bytes + (6 << 20), 48 << 20))

    # advisory cost estimate reflecting the windowed (skip-reduced) edge traffic
    win_tiles = int(tile_len.sum())
    win_edges = win_tiles * tile_e
    flops = 2 * (win_edges * (R * H + H * D)          # per-edge lin_rbf + folded lin_up
                 + tile_n * win_edges * D             # one-hot scatter matmul
                 + L * N_pad * D * D + N_pad * D * C_pad)
    bytes_accessed = (4 * win_edges * (H + R) + 4 * win_edges
                      + 2 * N_pad * C_pad
                      + 2 * (R * H + H * D) + 4 * (L * D * D + L * D + D * C_pad))
    cost = pl.CostEstimate(flops=int(flops),
                           transcendentals=int(L * N_pad * D),
                           bytes_accessed=int(bytes_accessed))

    out = pl.pallas_call(
        output_pp_kernel,
        out_shape=jax.ShapeDtypeStruct((N_pad, C_pad), jnp.bfloat16),
        grid_spec=grid_spec,
        compiler_params=pltpu.CompilerParams(
            dimension_semantics=("parallel", "arbitrary"),
            vmem_limit_bytes=vmem_limit,
        ),
        cost_estimate=cost,
    )(estart, elen, idx2d, x_s, rbf_s, w_rbf, w_up, w_lins, b_lins, w_out)

    return out[:num_nodes, :C].astype(jnp.float32)


def init_params(key, num_radial, hidden, out_emb, out_channels, num_layers):
    # Deterministic synthetic init (glorot_orthogonal not reproduced; shapes match __init__).
    ks = jax.random.split(key, 5)
    scale = 0.1
    return {
        # stored already transposed so the kernel does `x @ W`
        "w_rbf": scale * jax.random.normal(ks[0], (num_radial, hidden), jnp.float32),
        "w_up": scale * jax.random.normal(ks[1], (hidden, out_emb), jnp.float32),
        "w_lins": scale * jax.random.normal(ks[2], (num_layers, out_emb, out_emb), jnp.float32),
        # bias kept [L, 1, D] for clean TPU layout / broadcasting
        "b_lins": scale * jax.random.normal(ks[3], (num_layers, 1, out_emb), jnp.float32),
        # NOTE: reset_parameters() zero-fills lin.weight; nonzero here to exercise the kernel
        "w_out": scale * jax.random.normal(ks[4], (out_emb, out_channels), jnp.float32),
    }


def reference(x, rbf, i, num_nodes, params):
    edge = (rbf @ params["w_rbf"]) * x
    node = jax.ops.segment_sum(edge, i, num_segments=num_nodes)
    h = node @ params["w_up"]
    for l in range(params["w_lins"].shape[0]):
        z = h @ params["w_lins"][l] + params["b_lins"][l, 0]
        h = z * jax.nn.sigmoid(z)
    return h @ params["w_out"]


if __name__ == "__main__":
    # Small shapes consistent with OutputPPBlock (but big enough to exercise the grid)
    E = 512            # number of edges
    N = 256            # num_nodes
    num_radial = 16
    hidden = 32        # hidden_channels
    out_emb = 64       # out_emb_channels
    out_channels = 8
    num_layers = 2

    key = jax.random.PRNGKey(0)
    k_x, k_rbf, k_i, k_p = jax.random.split(key, 4)

    x = jax.random.normal(k_x, (E, hidden), jnp.float32)
    rbf = jax.random.normal(k_rbf, (E, num_radial), jnp.float32)
    i = jax.random.randint(k_i, (E,), 0, N, dtype=jnp.int32)
    params = init_params(k_p, num_radial, hidden, out_emb, out_channels, num_layers)

    out = output_pp_block(x, rbf, i, N, params, tile_n=128, tile_e=256)
    out = jax.block_until_ready(out)

    ref = reference(x, rbf, i, N, params)
    assert out.shape == (N, out_channels)
    # bf16 scatter-path MXU operands + bf16 output writeback, f32 accumulation:
    # documented tolerance vs the f32 reference
    assert jnp.allclose(out, ref, rtol=2e-2, atol=2e-2), "mismatch vs. reference"

    print("KERNEL_OK")
</pallas_src>

<mosaic_0001>
module attributes {stable_mosaic.version = 11 : i64} {
  func.func @output_pp_kernel(%arg0: i32, %arg1: i32, %arg2: memref<2xi32, #tpu.memory_space<smem>>, %arg3: memref<2xi32, #tpu.memory_space<smem>>, %arg4: memref<1x256xi32, #tpu.memory_space<vmem>>, %arg5: memref<256x32xf32, #tpu.memory_space<vmem>>, %arg6: memref<256x16xf32, #tpu.memory_space<vmem>>, %arg7: memref<16x32xbf16, #tpu.memory_space<vmem>>, %arg8: memref<32x64xbf16, #tpu.memory_space<vmem>>, %arg9: memref<2x64x64xf32, #tpu.memory_space<vmem>>, %arg10: memref<2x1x64xf32, #tpu.memory_space<vmem>>, %arg11: memref<64x128xf32, #tpu.memory_space<vmem>>, %arg12: memref<128x128xbf16, #tpu.memory_space<vmem>>, %arg13: memref<128x64xf32, #tpu.memory_space<vmem>>) attributes {dimension_semantics = [#tpu.dimension_semantics<parallel>, #tpu.dimension_semantics<arbitrary>], iteration_bounds = array<i64: 2, 2>, scalar_prefetch = 2 : i64, scratch_operands = 1 : i64, tpu.core_type = #tpu.core_type<tc>, window_params = [{transform_indices = @transform_0, window_bounds = array<i64: 1, 256>}, {transform_indices = @transform_1, window_bounds = array<i64: 256, 32>}, {transform_indices = @transform_2, window_bounds = array<i64: 256, 16>}, {pipeline_mode = #tpu.pipeline_mode<synchronous>, transform_indices = @transform_3, window_bounds = array<i64: 16, 32>}, {pipeline_mode = #tpu.pipeline_mode<synchronous>, transform_indices = @transform_4, window_bounds = array<i64: 32, 64>}, {pipeline_mode = #tpu.pipeline_mode<synchronous>, transform_indices = @transform_5, window_bounds = array<i64: 2, 64, 64>}, {pipeline_mode = #tpu.pipeline_mode<synchronous>, transform_indices = @transform_6, window_bounds = array<i64: 2, 1, 64>}, {pipeline_mode = #tpu.pipeline_mode<synchronous>, transform_indices = @transform_7, window_bounds = array<i64: 64, 128>}, {transform_indices = @transform_8, window_bounds = array<i64: 128, 128>}]} {
    %c128_i32 = arith.constant 128 : i32
    %0 = arith.muli %arg0, %c128_i32 : i32
    %c0_i32 = arith.constant 0 : i32
    %1 = arith.cmpi eq, %arg1, %c0_i32 : i32
    %2 = arith.extui %1 : i1 to i32
    %c0_i32_0 = arith.constant 0 : i32
    %3 = arith.cmpi ne, %2, %c0_i32_0 : i32
    scf.if %3 {
      %cst = arith.constant 0.000000e+00 : f32
      %12 = vector.broadcast %cst : f32 to vector<128x64xf32>
      %c0 = arith.constant 0 : index
      %c0_3 = arith.constant 0 : index
      %13 = vector.load %arg13[%c0, %c0_3] : memref<128x64xf32, #tpu.memory_space<vmem>>, vector<128x64xf32>
      tpu.vector_store %arg13[%c0, %c0_3], %12 {strides = array<i32>} : memref<128x64xf32, #tpu.memory_space<vmem>>, vector<128x64xf32>,
    } else {
    }
    %4 = arith.index_cast %arg0 : i32 to index
    %5 = memref.load %arg3[%4] : memref<2xi32, #tpu.memory_space<smem>>
    %6 = arith.cmpi slt, %arg1, %5 : i32
    %7 = arith.extui %6 : i1 to i32
    %c0_i32_1 = arith.constant 0 : i32
    %8 = arith.cmpi ne, %7, %c0_i32_1 : i32
    scf.if %8 {
      %c0 = arith.constant 0 : index
      %c0_3 = arith.constant 0 : index
      %12 = vector.load %arg6[%c0, %c0_3] : memref<256x16xf32, #tpu.memory_space<vmem>>, vector<256x16xf32>
      %13 = arith.truncf %12 : vector<256x16xf32> to vector<256x16xbf16>
      %c0_4 = arith.constant 0 : index
      %c0_5 = arith.constant 0 : index
      %14 = vector.load %arg7[%c0_4, %c0_5] : memref<16x32xbf16, #tpu.memory_space<vmem>>, vector<16x32xbf16>
      %cst = arith.constant dense<0.000000e+00> : vector<256x32xf32>
      %15 = tpu.matmul %13, %14, %cst {dimension_numbers = #tpu.dot_dimension_numbers<[1], [0], [0], [1], [0, 0, 1, 1], [], []>} : vector<256x16xbf16>, vector<16x32xbf16>, vector<256x32xf32> -> vector<256x32xf32>
      %c0_6 = arith.constant 0 : index
      %c0_7 = arith.constant 0 : index
      %16 = vector.load %arg5[%c0_6, %c0_7] : memref<256x32xf32, #tpu.memory_space<vmem>>, vector<256x32xf32>
      %17 = arith.mulf %15, %16 : vector<256x32xf32>
      %18 = arith.truncf %17 : vector<256x32xf32> to vector<256x32xbf16>
      %c0_8 = arith.constant 0 : index
      %c0_9 = arith.constant 0 : index
      %19 = vector.load %arg8[%c0_8, %c0_9] : memref<32x64xbf16, #tpu.memory_space<vmem>>, vector<32x64xbf16>
      %cst_10 = arith.constant dense<0.000000e+00> : vector<256x64xf32>
      %20 = tpu.matmul %18, %19, %cst_10 {dimension_numbers = #tpu.dot_dimension_numbers<[1], [0], [0], [1], [0, 0, 1, 1], [], []>} : vector<256x32xbf16>, vector<32x64xbf16>, vector<256x64xf32> -> vector<256x64xf32>
      %c0_11 = arith.constant 0 : index
      %c0_12 = arith.constant 0 : index
      %21 = vector.load %arg4[%c0_11, %c0_12] : memref<1x256xi32, #tpu.memory_space<vmem>>, vector<1x256xi32>
      %22 = vector.broadcast %0 : i32 to vector<1x256xi32>
      %23 = arith.subi %21, %22 : vector<1x256xi32>
      %24 = tpu.iota {dimensions = array<i32: 0>} : vector<128x256xi32>
      %25 = vector.broadcast %23 : vector<1x256xi32> to vector<128x256xi32>
      %26 = arith.cmpi eq, %24, %25 : vector<128x256xi32>
      %27 = arith.extui %26 : vector<128x256xi1> to vector<128x256xi32>
      %28 = arith.sitofp %27 : vector<128x256xi32> to vector<128x256xf32>
      %29 = arith.truncf %28 : vector<128x256xf32> to vector<128x256xbf16>
      %c0_13 = arith.constant 0 : index
      %c0_14 = arith.constant 0 : index
      %30 = vector.load %arg13[%c0_13, %c0_14] : memref<128x64xf32, #tpu.memory_space<vmem>>, vector<128x64xf32>
      %31 = arith.truncf %20 : vector<256x64xf32> to vector<256x64xbf16>
      %cst_15 = arith.constant dense<0.000000e+00> : vector<128x64xf32>
      %32 = tpu.matmul %29, %31, %cst_15 {dimension_numbers = #tpu.dot_dimension_numbers<[1], [0], [0], [1], [0, 0, 1, 1], [], []>} : vector<128x256xbf16>, vector<256x64xbf16>, vector<128x64xf32> -> vector<128x64xf32>
      %33 = arith.addf %30, %32 : vector<128x64xf32>
      %c0_16 = arith.constant 0 : index
      %c0_17 = arith.constant 0 : index
      %34 = vector.load %arg13[%c0_16, %c0_17] : memref<128x64xf32, #tpu.memory_space<vmem>>, vector<128x64xf32>
      tpu.vector_store %arg13[%c0_16, %c0_17], %33 {strides = array<i32>} : memref<128x64xf32, #tpu.memory_space<vmem>>, vector<128x64xf32>,
    } else {
    }
    %c1_i32 = arith.constant 1 : i32
    %9 = arith.cmpi eq, %arg1, %c1_i32 : i32
    %10 = arith.extui %9 : i1 to i32
    %c0_i32_2 = arith.constant 0 : i32
    %11 = arith.cmpi ne, %10, %c0_i32_2 : i32
    scf.if %11 {
      %c0 = arith.constant 0 : index
      %c0_3 = arith.constant 0 : index
      %12 = vector.load %arg13[%c0, %c0_3] : memref<128x64xf32, #tpu.memory_space<vmem>>, vector<128x64xf32>
      %c0_4 = arith.constant 0 : index
      %c0_5 = arith.constant 0 : index
      %c0_6 = arith.constant 0 : index
      %13 = vector.load %arg9[%c0_4, %c0_5, %c0_6] : memref<2x64x64xf32, #tpu.memory_space<vmem>>, vector<1x64x64xf32>
      %14 = vector.shape_cast %13 : vector<1x64x64xf32> to vector<64x64xf32>
      %cst = arith.constant dense<0.000000e+00> : vector<128x64xf32>
      %15 = tpu.matmul %12, %14, %cst {dimension_numbers = #tpu.dot_dimension_numbers<[1], [0], [0], [1], [0, 0, 1, 1], [], []>} : vector<128x64xf32>, vector<64x64xf32>, vector<128x64xf32> -> vector<128x64xf32>
      %c0_7 = arith.constant 0 : index
      %c0_8 = arith.constant 0 : index
      %c0_9 = arith.constant 0 : index
      %16 = vector.load %arg10[%c0_7, %c0_8, %c0_9] : memref<2x1x64xf32, #tpu.memory_space<vmem>>, vector<1x1x64xf32>
      %17 = vector.shape_cast %16 : vector<1x1x64xf32> to vector<1x64xf32>
      %18 = vector.broadcast %17 : vector<1x64xf32> to vector<128x64xf32>
      %19 = arith.addf %15, %18 : vector<128x64xf32>
      %20 = arith.negf %19 : vector<128x64xf32>
      %21 = math.exp %20 : vector<128x64xf32>
      %cst_10 = arith.constant 1.000000e+00 : f32
      %22 = vector.broadcast %cst_10 : f32 to vector<128x64xf32>
      %23 = arith.addf %22, %21 : vector<128x64xf32>
      %24 = arith.divf %22, %23 : vector<128x64xf32>
      %25 = arith.mulf %19, %24 : vector<128x64xf32>
      %c1 = arith.constant 1 : index
      %c0_11 = arith.constant 0 : index
      %c0_12 = arith.constant 0 : index
      %26 = vector.load %arg9[%c1, %c0_11, %c0_12] : memref<2x64x64xf32, #tpu.memory_space<vmem>>, vector<1x64x64xf32>
      %27 = vector.shape_cast %26 : vector<1x64x64xf32> to vector<64x64xf32>
      %cst_13 = arith.constant dense<0.000000e+00> : vector<128x64xf32>
      %28 = tpu.matmul %25, %27, %cst_13 {dimension_numbers = #tpu.dot_dimension_numbers<[1], [0], [0], [1], [0, 0, 1, 1], [], []>} : vector<128x64xf32>, vector<64x64xf32>, vector<128x64xf32> -> vector<128x64xf32>
      %c1_14 = arith.constant 1 : index
      %c0_15 = arith.constant 0 : index
      %c0_16 = arith.constant 0 : index
      %29 = vector.load %arg10[%c1_14, %c0_15, %c0_16] : memref<2x1x64xf32, #tpu.memory_space<vmem>>, vector<1x1x64xf32>
      %30 = vector.shape_cast %29 : vector<1x1x64xf32> to vector<1x64xf32>
      %31 = vector.broadcast %30 : vector<1x64xf32> to vector<128x64xf32>
      %32 = arith.addf %28, %31 : vector<128x64xf32>
      %33 = arith.negf %32 : vector<128x64xf32>
      %34 = math.exp %33 : vector<128x64xf32>
      %cst_17 = arith.constant 1.000000e+00 : f32
      %35 = vector.broadcast %cst_17 : f32 to vector<128x64xf32>
      %36 = arith.addf %35, %34 : vector<128x64xf32>
      %37 = arith.divf %35, %36 : vector<128x64xf32>
      %38 = arith.mulf %32, %37 : vector<128x64xf32>
      %c0_18 = arith.constant 0 : index
      %c0_19 = arith.constant 0 : index
      %39 = vector.load %arg11[%c0_18, %c0_19] : memref<64x128xf32, #tpu.memory_space<vmem>>, vector<64x128xf32>
      %cst_20 = arith.constant dense<0.000000e+00> : vector<128x128xf32>
      %40 = tpu.matmul %38, %39, %cst_20 {dimension_numbers = #tpu.dot_dimension_numbers<[1], [0], [0], [1], [0, 0, 1, 1], [], []>} : vector<128x64xf32>, vector<64x128xf32>, vector<128x128xf32> -> vector<128x128xf32>
      %41 = arith.truncf %40 : vector<128x128xf32> to vector<128x128xbf16>
      %c0_21 = arith.constant 0 : index
      %c0_22 = arith.constant 0 : index
      %42 = vector.load %arg12[%c0_21, %c0_22] : memref<128x128xbf16, #tpu.memory_space<vmem>>, vector<128x128xbf16>
      tpu.vector_store %arg12[%c0_21, %c0_22], %41 {strides = array<i32>} : memref<128x128xbf16, #tpu.memory_space<vmem>>, vector<128x128xbf16>,
    } else {
    }
    return
  }
  func.func @transform_0(%arg0: i32, %arg1: i32, %arg2: memref<2xi32, #tpu.memory_space<smem>>, %arg3: memref<2xi32, #tpu.memory_space<smem>>) -> (i32, i32) {
    %0 = arith.index_cast %arg0 : i32 to index
    %1 = memref.load %arg2[%0] : memref<2xi32, #tpu.memory_space<smem>>
    %2 = arith.index_cast %arg0 : i32 to index
    %3 = memref.load %arg3[%2] : memref<2xi32, #tpu.memory_space<smem>>
    %c1_i32 = arith.constant 1 : i32
    %4 = arith.subi %3, %c1_i32 : i32
    %c0_i32 = arith.constant 0 : i32
    %5 = arith.maxsi %4, %c0_i32 : i32
    %6 = arith.minsi %arg1, %5 : i32
    %7 = arith.addi %1, %6 : i32
    %c0_i32_0 = arith.constant 0 : i32
    %c0_i32_1 = arith.constant 0 : i32
    return %c0_i32_0, %7 : i32, i32
  }
  func.func @transform_1(%arg0: i32, %arg1: i32, %arg2: memref<2xi32, #tpu.memory_space<smem>>, %arg3: memref<2xi32, #tpu.memory_space<smem>>) -> (i32, i32) {
    %0 = arith.index_cast %arg0 : i32 to index
    %1 = memref.load %arg2[%0] : memref<2xi32, #tpu.memory_space<smem>>
    %2 = arith.index_cast %arg0 : i32 to index
    %3 = memref.load %arg3[%2] : memref<2xi32, #tpu.memory_space<smem>>
    %c1_i32 = arith.constant 1 : i32
    %4 = arith.subi %3, %c1_i32 : i32
    %c0_i32 = arith.constant 0 : i32
    %5 = arith.maxsi %4, %c0_i32 : i32
    %6 = arith.minsi %arg1, %5 : i32
    %7 = arith.addi %1, %6 : i32
    %c0_i32_0 = arith.constant 0 : i32
    %c0_i32_1 = arith.constant 0 : i32
    return %7, %c0_i32_0 : i32, i32
  }
  func.func @transform_2(%arg0: i32, %arg1: i32, %arg2: memref<2xi32, #tpu.memory_space<smem>>, %arg3: memref<2xi32, #tpu.memory_space<smem>>) -> (i32, i32) {
    %0 = arith.index_cast %arg0 : i32 to index
    %1 = memref.load %arg2[%0] : memref<2xi32, #tpu.memory_space<smem>>
    %2 = arith.index_cast %arg0 : i32 to index
    %3 = memref.load %arg3[%2] : memref<2xi32, #tpu.memory_space<smem>>
    %c1_i32 = arith.constant 1 : i32
    %4 = arith.subi %3, %c1_i32 : i32
    %c0_i32 = arith.constant 0 : i32
    %5 = arith.maxsi %4, %c0_i32 : i32
    %6 = arith.minsi %arg1, %5 : i32
    %7 = arith.addi %1, %6 : i32
    %c0_i32_0 = arith.constant 0 : i32
    %c0_i32_1 = arith.constant 0 : i32
    return %7, %c0_i32_0 : i32, i32
  }
  func.func @transform_3(%arg0: i32, %arg1: i32, %arg2: memref<2xi32, #tpu.memory_space<smem>>, %arg3: memref<2xi32, #tpu.memory_space<smem>>) -> (i32, i32) {
    %c0_i32 = arith.constant 0 : i32
    %c0_i32_0 = arith.constant 0 : i32
    %c0_i32_1 = arith.constant 0 : i32
    return %c0_i32, %c0_i32_0 : i32, i32
  }
  func.func @transform_4(%arg0: i32, %arg1: i32, %arg2: memref<2xi32, #tpu.memory_space<smem>>, %arg3: memref<2xi32, #tpu.memory_space<smem>>) -> (i32, i32) {
    %c0_i32 = arith.constant 0 : i32
    %c0_i32_0 = arith.constant 0 : i32
    %c0_i32_1 = arith.constant 0 : i32
    return %c0_i32, %c0_i32_0 : i32, i32
  }
  func.func @transform_5(%arg0: i32, %arg1: i32, %arg2: memref<2xi32, #tpu.memory_space<smem>>, %arg3: memref<2xi32, #tpu.memory_space<smem>>) -> (i32, i32, i32) {
    %c0_i32 = arith.constant 0 : i32
    %c0_i32_0 = arith.constant 0 : i32
    %c0_i32_1 = arith.constant 0 : i32
    %c0_i32_2 = arith.constant 0 : i32
    return %c0_i32, %c0_i32_0, %c0_i32_1 : i32, i32, i32
  }
  func.func @transform_6(%arg0: i32, %arg1: i32, %arg2: memref<2xi32, #tpu.memory_space<smem>>, %arg3: memref<2xi32, #tpu.memory_space<smem>>) -> (i32, i32, i32) {
    %c0_i32 = arith.constant 0 : i32
    %c0_i32_0 = arith.constant 0 : i32
    %c0_i32_1 = arith.constant 0 : i32
    %c0_i32_2 = arith.constant 0 : i32
    return %c0_i32, %c0_i32_0, %c0_i32_1 : i32, i32, i32
  }
  func.func @transform_7(%arg0: i32, %arg1: i32, %arg2: memref<2xi32, #tpu.memory_space<smem>>, %arg3: memref<2xi32, #tpu.memory_space<smem>>) -> (i32, i32) {
    %c0_i32 = arith.constant 0 : i32
    %c0_i32_0 = arith.constant 0 : i32
    %c0_i32_1 = arith.constant 0 : i32
    return %c0_i32, %c0_i32_0 : i32, i32
  }
  func.func @transform_8(%arg0: i32, %arg1: i32, %arg2: memref<2xi32, #tpu.memory_space<smem>>, %arg3: memref<2xi32, #tpu.memory_space<smem>>) -> (i32, i32) {
    %c0_i32 = arith.constant 0 : i32
    %c0_i32_0 = arith.constant 0 : i32
    return %arg0, %c0_i32 : i32, i32
  }
}

</mosaic_0001>

<bundles_post_ra>
// kernel: tpu_custom_call.1
= control target key start
LH: loop header
LB: loop body
LE: loop exit
PB: predicated region body
PF: predicated region fallthrough
CT: control target
= control target key end

     0   :  { %s4390_s0 = inlined_call_operand.vmem [shape: s32[2], index: 0, kind: input, shape index: {}]   ;;  %s4391_s2 = inlined_call_operand.vmem [shape: s32[1,512], index: 2, kind: input, shape index: {}]   ;;  %s4392_s3 = inlined_call_operand.vmem [shape: f32[512,32], index: 3, kind: input, shape index: {}]   ;;  %s4393_s4 = inlined_call_operand.vmem [shape: f32[512,16], index: 4, kind: input, shape index: {}]   ;;  %s4394_s5 = inlined_call_operand.vmem [shape: bf16[16,32], index: 5, kind: input, shape index: {}]   ;;  %s4395_s6 = inlined_call_operand.vmem [shape: bf16[32,64], index: 6, kind: input, shape index: {}]   ;;  %s4396_s7 = inlined_call_operand.vmem [shape: f32[2,64,64], index: 7, kind: input, shape index: {}]   ;;  %s4397_s8 = inlined_call_operand.vmem [shape: f32[2,1,64], index: 8, kind: input, shape index: {}]   ;;  %s4398_s9 = inlined_call_operand.vmem [shape: f32[64,128], index: 9, kind: input, shape index: {}]   ;;  %s4399_s10 = inlined_call_operand.hbm [shape: bf16[256,128], index: 10, kind: output, shape index: {}]   ;;  %s4400_s1 = inlined_call_operand.vmem [shape: s32[2], index: 1, kind: input, shape index: {}]  }
   0x1   :  { %s15_s15 = sshll.u32 %s4390_s0, 4  ;;  %s19_s18 = sshll.u32 %s4400_s1, 4  ;;  %s16_s15 = int_to_ptr.vmem [resolvable:$true] %s15_s15  ;;  %s20_s18 = int_to_ptr.vmem [resolvable:$true] %s19_s18 }
   0x2   :  { %s3420_s19 = scalar_lea.vmem %s16_s15, 16  ;;  %p3425_p1 = scmp.lt.s32.totalorder %s16_s15, %s16_s15 }
   0x3   :  { %p3421_p0 = scmp.ne.s32.totalorder %s16_s15, %s3420_s19  ;;  %p3426_p2 = scmp.lt.s32.totalorder %s3420_s19, %s3420_s19 }
   0x5   :  { %p3427_p3 = por %p3426_p2, %p3425_p1 }
   0x7   :  { %p3428_p4 = pnand %p3427_p3, %p3421_p0 }
   0x9   :  { %3431 = shalt.err (!%p3428_p4)  }
   0xa   :  { %s3542_s20 = smov [#allocation4]   ;;  %s3432_s21 = scalar_lea.vmem %s20_s18, 16 }
   0xb   :  { %18 = dma.vmem_to_smem %s16_s15, 16, %s3542_s20, [#allocation3] }
   0xc   :  { %p3433_p5 = scmp.ne.s32.totalorder %s20_s18, %s3432_s21  ;;  %p3437_p6 = scmp.lt.s32.totalorder %s20_s18, %s20_s18 }
   0xd   :  { %p3438_p7 = scmp.lt.s32.totalorder %s3432_s21, %s3432_s21 }
   0xf   :  { %p3439_p8 = por %p3438_p7, %p3437_p6 }
  0x11   :  { %p3440_p9 = pnand %p3439_p8, %p3433_p5 }
  0x13   :  { %3443 = shalt.err (!%p3440_p9)  }
  0x14   :  { %s3543_s0 = smov [#allocation5]  }
  0x15   :  { %22 = dma.vmem_to_smem %s20_s18, 16, %s3543_s0, [#allocation3] }
  0x16   :  { %3504 = dma.done.wait [#allocation3], 32 }
  0x17   :  { %3505 = vsyncadd [#allocation3], 4294967264 }
  0x18   :  { %24 = sfence }
  0x19   :  { %25 = vsyncpa [#allocation7], 0 }
  0x1a   :  { %27 = vsyncpa [#allocation7 + $0x1], 0  ;;  %s3610_s1 = smov 0   ;;  %s3612_s22 = smov 0  }
  0x1b   :  { %s3614_s23 = smov 0   ;;  %s3616_s24 = smov 0  }
  0x1c   :  { %s3618_s25 = smov 0   ;;  %s3620_s26 = smov 0  }
  0x1d   :  { %s3622_s27 = smov 0   ;;  %s3624_s28 = smov 0  }
  0x1e LB: > { %4408 = sst [smem:[#allocation10_spill]] %s3512_s1  ;;  %s2494_s29 = sadd.s32 4294967295, %s3540_s28   ;;  %s3540_s28 = sphi %s3624_s28, %s33_s28   ;;  %s3536_s27 = sphi %s3622_s27, %s4463_s27   ;;  %s3532_s26 = sphi %s3620_s26, %s4462_s26   ;;  %s3528_s25 = sphi %s3618_s25, %s4467_s25   ;;  %s3524_s24 = sphi %s3616_s24, %s4466_s24   ;;  %s3520_s23 = sphi %s3614_s23, %s4459_s23   ;;  %s3516_s22 = sphi %s3612_s22, %s4465_s22   ;;  %s3512_s1 = sphi %s3610_s1, %s4464_s1  }
  0x1f   : > { %4409 = sst [smem:[#allocation11_spill]] %s3520_s23  ;;  %s2495_s30 = sadd.s32 4294967294, %s3540_s28  }
  0x20   : > { %4410 = sst [smem:[#allocation12_spill]] %s3532_s26  ;;  %s42_s11 = sadd.s32 1, %s3532_s26 }
  0x21   : > { %4411 = sst [smem:[#allocation13_spill]] %s3536_s27  ;;  %p43_p10 = scmp.ge.s32.totalorder %s42_s11, 2 }
  0x22   : > { %s45_s12 = sadd.s32 1, %s3536_s27  ;;  %p293_p11 = scmp.ne.s32.totalorder %s3520_s23, %s3516_s22 }
  0x23   : > { %p294_p12 = scmp.eq.s32.totalorder %s2494_s29, 3  ;;  %s4469_s11 = smov (%p43_p10, %s42_s11), 0 }
  0x24   : > { %4412 = sst [smem:[#allocation14_spill]] %s4469_s11  ;;  %s4471_s12 = smov (!%p43_p10, %s45_s12), %s3536_s27 }
  0x25   : > { %p3659_p13 = por %p294_p12, %p293_p11  ;;  %p299_p0 = scmp.ne.s32.totalorder %s3516_s22, %s3512_s1 }
  0x26   : > { %p47_p1 = scmp.ge.s32.totalorder %s4471_s12, 2  ;;  %p300_p2 = scmp.eq.s32.totalorder %s2495_s30, 3 }
  0x27   : > { %p2504_p3 = scmp.ge.s32.totalorder %s3540_s28, 1  ;;  %p407_p4 = scmp.lt.s32.totalorder %s3540_s28, 5 }
  0x28   : > { %s4473_s12 = smov (%p47_p1, %s4471_s12), 0  ;;  %p3669_p5 = por %p300_p2, %p299_p0 }
  0x29   : > { %4414 = sst [smem:[#allocation15_spill]] %s4473_s12  ;;  %p408_p6 = pnand %p2504_p3, %p407_p4 }
  0x2a   : > { %s4415_s14 = scalar_select %p3669_p5, 1, 0 }
  0x2b   : > { %s280_s15 = ssub.s32 %s3536_s27, %s4473_s12  ;;  %s283_s16 = sadd.s32 1, %s3520_s23 }
  0x2c   : > { %4416 = sst [smem:[#allocation16_spill]] %s4415_s14  ;;  %p281_p7 = scmp.eq.s32.totalorder %s280_s15, 0 }
  0x2d   : > { %411 = sbr.rel (%p408_p6) target bundleno = 1661 (0x67d), region = 52  ;;  %s4402_s18 = sand.u32 (!%p408_p6), 1, %s3516_s22  }
  0x2e   : > { %s3677_s17 = scalar_select %p281_p7, %s3520_s23, %s283_s16  }
  0x2f   : > { %s3682_s19 = sshll.u32 (!%p408_p6), %s4402_s18, 6  ;;  %s475_s20 = sld [smem:[#allocation5 + %s3528_s25]] (!%p408_p6) }
  0x30   : > { %4417 = sst [smem:[#allocation17_spill]] %s3677_s17  ;;  %s3714_s23 = scalar_lea.vmem (!%p408_p6), [#allocation6], %s3682_s19 }
  0x31   : > { %s496_s21 = sld [smem:[#allocation5 + %s3528_s25]] (!%p408_p6)  ;;  %p2515_p4 = scmp.ne.s32.totalorder (!%p408_p6), %s3524_s24, 0 }
  0x32   : > { %s518_s30 = sld [smem:[#allocation5 + %s3528_s25]] (!%p408_p6) }
  0x33   : > { %s474_s15 = sld [smem:[#allocation4 + %s3528_s25]] (!%p408_p6) }
  0x34   : > { %s495_s12 = sld [smem:[#allocation4 + %s3528_s25]]  ;;  %vm546_vm0 = vcmask (!%p2515_p4), 523264   ;;  %v3544_v0 = vmov (!%p2515_p4), 0.0  }
  0x35   : > { %s2506_s29 = sadd.s32 4294967295, %s475_s20  ;;  %547 = vst.msk [vmem:[#allocation2] sm:$0xff] (!%p2515_p4), %vm546_vm0, %v3544_v0  ;;  %548 = vst.msk [vmem:[#allocation2 + $0x8] sm:$0xff] (!%p2515_p4), %vm546_vm0, %v3544_v0 }
  0x36   : > { %p477_p8 = scmp.gt.s32.totalorder %s2506_s29, 0  ;;  %549 = vst.msk [vmem:[#allocation2 + $0x10] sm:$0xff] (!%p2515_p4), %vm546_vm0, %v3544_v0  ;;  %550 = vst.msk [vmem:[#allocation2 + $0x18] sm:$0xff] (!%p2515_p4), %vm546_vm0, %v3544_v0 }
  0x37   : > { %s2508_s16 = sadd.s32 4294967295, %s496_s21  ;;  %551 = vst.msk [vmem:[#allocation2 + $0x20] sm:$0xff] (!%p2515_p4), %vm546_vm0, %v3544_v0  ;;  %552 = vst.msk [vmem:[#allocation2 + $0x28] sm:$0xff] (!%p2515_p4), %vm546_vm0, %v3544_v0 }
  0x38   : > { %s4475_s29 = smov (!%p477_p8, %s2506_s29), 0  ;;  %p498_p9 = scmp.gt.s32.totalorder %s2508_s16, 0  ;;  %553 = vst.msk [vmem:[#allocation2 + $0x30] sm:$0xff] (!%p2515_p4), %vm546_vm0, %v3544_v0  ;;  %554 = vst.msk [vmem:[#allocation2 + $0x38] sm:$0xff] (!%p2515_p4), %vm546_vm0, %v3544_v0 }
  0x39   : > { %p479_p10 = scmp.lt.s32.totalorder %s3524_s24, %s4475_s29  ;;  %s2511_s18 = sadd.s32 4294967295, %s518_s30  ;;  %555 = vst.msk [vmem:[#allocation2 + $0x40] sm:$0xff] (!%p2515_p4), %vm546_vm0, %v3544_v0  ;;  %556 = vst.msk [vmem:[#allocation2 + $0x48] sm:$0xff] (!%p2515_p4), %vm546_vm0, %v3544_v0 }
  0x3a   : > { %s4477_s16 = smov (!%p498_p9, %s2508_s16), 0  ;;  %p520_p0 = scmp.gt.s32.totalorder %s2511_s18, 0  ;;  %557 = vst.msk [vmem:[#allocation2 + $0x50] sm:$0xff] (!%p2515_p4), %vm546_vm0, %v3544_v0  ;;  %558 = vst.msk [vmem:[#allocation2 + $0x58] sm:$0xff] (!%p2515_p4), %vm546_vm0, %v3544_v0 }
  0x3b   : > { %s480_s11 = scalar_select %p479_p10, %s3524_s24, %s4475_s29 }
  0x3c   : > { %p500_p11 = scmp.lt.s32.totalorder %s3524_s24, %s4477_s16  ;;  %s517_s29 = sld [smem:[#allocation4 + %s3528_s25]]  ;;  %559 = vst.msk [vmem:[#allocation2 + $0x60] sm:$0xff] (!%p2515_p4), %vm546_vm0, %v3544_v0  ;;  %560 = vst.msk [vmem:[#allocation2 + $0x68] sm:$0xff] (!%p2515_p4), %vm546_vm0, %v3544_v0 }
  0x3d   : > { %s481_s27 = sadd.s32 %s480_s11, %s474_s15  ;;  %s4481_s18 = smov (!%p520_p0, %s2511_s18), 0  ;;  %561 = vst.msk [vmem:[#allocation2 + $0x70] sm:$0xff] (!%p2515_p4), %vm546_vm0, %v3544_v0  ;;  %562 = vst.msk [vmem:[#allocation2 + $0x78] sm:$0xff] (!%p2515_p4), %vm546_vm0, %v3544_v0 }
  0x3e   : > { %s2507_s26 = sshll.u32 %s481_s27, 1  ;;  %p522_p2 = scmp.lt.s32.totalorder %s3524_s24, %s4481_s18 }
  0x3f   : > { %p483_p12 = scmp.lt.s32.totalorder %s2507_s26, 3 }
  0x40   : > { %s501_s20 = scalar_select %p500_p11, %s3524_s24, %s4477_s16 }
  0x41   : > { %s4479_s26 = smov (!%p483_p12, %s2507_s26), 3 }
  0x42   : > { %s502_s21 = sadd.s32 %s501_s20, %s495_s12 }
  0x43   : > { %s2509_s14 = sshll.u32 %s502_s21, 5 }
  0x44   : > { %p504_p1 = scmp.lt.s32.totalorder %s2509_s14, 63 }
  0x45   : > { %s523_s16 = scalar_select %p522_p2, %s3524_s24, %s4481_s18 }
  0x46   : > { %s4483_s14 = smov (!%p504_p1, %s2509_s14), 63 }
  0x47   : > { %s2510_s11 = sshll.u32 %s4483_s14, 3  ;;  %s524_s1 = sadd.s32 %s523_s16, %s517_s29 }
  0x48   : > { %s3705_s15 = scalar_lea.vmem %s4392_s3, %s2510_s11  ;;  %s2512_s12 = sshll.u32 %s524_s1, 5 }
  0x49   : > { %p526_p3 = scmp.lt.s32.totalorder %s2512_s12, 63  ;;  %545 = sbr.rel (%p2515_p4) target bundleno = 80 (0x50), region = 56 }
  0x4b   : > { %s4485_s12 = smov (!%p526_p3, %s2512_s12), 63 }
  0x4c   : > { %s2513_s17 = sshll.u32 %s4485_s12, 3 }
  0x4d   : > { %s3711_s21 = scalar_lea.vmem %s4393_s4, %s2513_s17 }
  0x50 PF: > { %s563_s1 = sld [smem:[#allocation5 + %s3528_s25]] }
  0x56   : > { %p2516_p6 = scmp.ge.s32.totalorder %s3524_s24, %s563_s1 }
  0x57   : > { %v3289_v1 = vld [vmem:[%s4394_s5] sm:$0xff] (!%p2516_p6)   ;;  %v569_v3 = vld [vmem:[%s3711_s21 + $0x8] sm:$0xff] (!%p2516_p6)  ;;  %vm624_vm1 = vcmask (!%p2516_p6), 130048   ;;  %v570_v4 = vld [vmem:[%s3711_s21 + $0x10] sm:$0xff] (!%p2516_p6)  ;;  %vm930_vm2 = vcmask (!%p2516_p6), 261120   ;;  %s4418_s16 = scalar_lea.vmem (!%p2516_p6), %s4391_s2, %s4479_s26  ;;  %s4419_s12 = sshll.u32 (!%p2516_p6), %s3528_s25, 7 }
  0x58   : > { %567 = sbr.rel (%p2516_p6) target bundleno = 869 (0x365), region = 60  ;;  %v568_v2 = vld [vmem:[%s3711_s21] sm:$0xff] (!%p2516_p6)  ;;  %2964 = vmatprep.subr.bf16.mxu0 (!%p2516_p6), %v3289_v1  ;;  %v571_v6 = vld [vmem:[%s3711_s21 + $0x18] sm:$0xff] (!%p2516_p6)  ;;  %v573_v8 = vld [vmem:[%s3711_s21 + $0x28] sm:$0xff] (!%p2516_p6)  ;;  %3202 = vmatprep.subr.bf16.mxu1 (!%p2516_p6), %v3289_v1 }
  0x59   : > { %v600_v5 = vpack.c.bf16 (!%p2516_p6), %v569_v3, %v568_v2  ;;  %v572_v7 = vld [vmem:[%s3711_s21 + $0x20] sm:$0xff] (!%p2516_p6)  ;;  %2965 = vmatpush3.bf16.msra.mxu0 (!%p2516_p6), %v3289_v1  ;;  %v601_v9 = vpack.c.bf16 (!%p2516_p6), %v571_v6, %v570_v4  ;;  %3203 = vmatpush3.bf16.msra.mxu1 (!%p2516_p6), %v3289_v1  ;;  %v574_v11 = vld [vmem:[%s3711_s21 + $0x30] sm:$0xff] (!%p2516_p6)  ;;  %v575_v12 = vld [vmem:[%s3711_s21 + $0x38] sm:$0xff] (!%p2516_p6) }
  0x5a   : > { %v602_v10 = vpack.c.bf16 (!%p2516_p6), %v573_v8, %v572_v7  ;;  %v584_v13 = vld [vmem:[%s3711_s21 + $0x80] sm:$0xff] (!%p2516_p6)  ;;  %v585_v14 = vld [vmem:[%s3711_s21 + $0x88] sm:$0xff] (!%p2516_p6)  ;;  %v586_v16 = vld [vmem:[%s3711_s21 + $0x90] sm:$0xff] (!%p2516_p6)  ;;  %v603_v24 = vpack.c.bf16 (!%p2516_p6), %v575_v12, %v574_v11 }
  0x5b   : > { %2966 = vmatprep.mubr.msk.bf16.mxu0 (!%p2516_p6), %vm624_vm1, %v600_v5  ;;  %v608_v15 = vpack.c.bf16 (!%p2516_p6), %v585_v14, %v584_v13  ;;  %v587_v17 = vld [vmem:[%s3711_s21 + $0x98] sm:$0xff] (!%p2516_p6)  ;;  %v588_v18 = vld [vmem:[%s3711_s21 + $0xa0] sm:$0xff] (!%p2516_p6)  ;;  %v577_v20 = vld [vmem:[%s3711_s21 + $0x48] sm:$0xff] (!%p2516_p6) }
  0x5c   : > { %2967 = vmatmul.mubr.msk.bf16.vlgmr.msra.gmra.mrb[0].mxu0 (!%p2516_p6), %vm624_vm1, %v601_v9  ;;  %v576_v19 = vld [vmem:[%s3711_s21 + $0x40] sm:$0xff] (!%p2516_p6)  ;;  %v609_v21 = vpack.c.bf16 (!%p2516_p6), %v587_v17, %v586_v16  ;;  %v589_v22 = vld [vmem:[%s3711_s21 + $0xa8] sm:$0xff] (!%p2516_p6)  ;;  %v590_v25 = vld [vmem:[%s3711_s21 + $0xb0] sm:$0xff] (!%p2516_p6) }
  0x5d   : > { %2970 = vmatprep.mubr.msk.bf16.mxu0 (!%p2516_p6), %vm624_vm1, %v602_v10  ;;  %2982 = vmatprep.mubr.msk.bf16.mxu1 (!%p2516_p6), %vm624_vm1, %v608_v15  ;;  %v610_v23 = vpack.c.bf16 (!%p2516_p6), %v589_v22, %v588_v18  ;;  %v591_v26 = vld [vmem:[%s3711_s21 + $0xb8] sm:$0xff] (!%p2516_p6)  ;;  %v604_v27 = vpack.c.bf16 (!%p2516_p6), %v577_v20, %v576_v19  ;;  %v592_v28 = vld [vmem:[%s3711_s21 + $0xc0] sm:$0xff] (!%p2516_p6)  ;;  %v593_v29 = vld [vmem:[%s3711_s21 + $0xc8] sm:$0xff] (!%p2516_p6) }
  0x5e   : > { %2983 = vmatmul.mubr.msk.bf16.vlgmr.msra.gmra.mrb[0].mxu1 (!%p2516_p6), %vm624_vm1, %v609_v21  ;;  %v3290_v30 = vld [vmem:[%s4395_s6] sm:$0xff] (!%p2516_p6)   ;;  %v3291_v31 = vld [vmem:[%s4395_s6 + $0x8] sm:$0xff] (!%p2516_p6)   ;;  %v611_v32 = vpack.c.bf16 (!%p2516_p6), %v591_v26, %v590_v25  ;;  %v578_v33 = vld [vmem:[%s3711_s21 + $0x50] sm:$0xff] (!%p2516_p6)  ;;  %v612_v35 = vpack.c.bf16 (!%p2516_p6), %v593_v29, %v592_v28 }
  0x5f   : > { %2986 = vmatprep.mubr.msk.bf16.mxu1 %vm624_vm1, %v610_v23  ;;  %2998 = vmatprep.subr.bf16.mxu1 %v3290_v30  ;;  %v579_v34 = vld [vmem:[%s3711_s21 + $0x58] sm:$0xff]  ;;  %v580_v36 = vld [vmem:[%s3711_s21 + $0x60] sm:$0xff]  ;;  %v581_v37 = vld [vmem:[%s3711_s21 + $0x68] sm:$0xff] }
  0x60   : > { %2999 = vmatpush3.bf16.msra.mxu1 %v3290_v30  ;;  %v605_v38 = vpack.c.bf16 %v579_v34, %v578_v33  ;;  %v606_v39 = vpack.c.bf16 %v581_v37, %v580_v36  ;;  %v594_v40 = vld [vmem:[%s3711_s21 + $0xd0] sm:$0xff]  ;;  %v595_v41 = vld [vmem:[%s3711_s21 + $0xd8] sm:$0xff]  ;;  %v596_v42 = vld [vmem:[%s3711_s21 + $0xe0] sm:$0xff] }
  0x61   : > { %3000 = vmatprep.subr.bf16.mxu1 %v3291_v31  ;;  %v597_v43 = vld [vmem:[%s3711_s21 + $0xe8] sm:$0xff]  ;;  %v613_v44 = vpack.c.bf16 %v595_v41, %v594_v40  ;;  %v582_v45 = vld [vmem:[%s3711_s21 + $0x70] sm:$0xff]  ;;  %v583_v46 = vld [vmem:[%s3711_s21 + $0x78] sm:$0xff] }
  0x62   : > { %v614_v47 = vpack.c.bf16 %v597_v43, %v596_v42  ;;  %v607_v48 = vpack.c.bf16 %v583_v46, %v582_v45  ;;  %v598_v49 = vld [vmem:[%s3711_s21 + $0xf0] sm:$0xff]  ;;  %v599_v50 = vld [vmem:[%s3711_s21 + $0xf8] sm:$0xff]  ;;  %v834_v56 = vld [vmem:[%s3705_s15] sm:$0xff] }
  0x63   : > { %v615_v51 = vpack.c.bf16 %v599_v50, %v598_v49  ;;  %v836_v53 = vld [vmem:[%s3705_s15 + $0x10] sm:$0xff]  ;;  %v837_v54 = vld [vmem:[%s3705_s15 + $0x18] sm:$0xff]  ;;  %v835_v57 = vld [vmem:[%s3705_s15 + $0x8] sm:$0xff] }
  0x64   : > { %2971 = vmatmul.mubr.msk.bf16.gmra.mrb[4].mxu0 %vm624_vm1, %v603_v24  ;;  %3001 = vmatpush3.bf16.msra.mxu1 %v3291_v31  ;;  %v852_v59 = vld [vmem:[%s3705_s15 + $0x90] sm:$0xff]  ;;  %v850_v63 = vld [vmem:[%s3705_s15 + $0x80] sm:$0xff]  ;;  %v853_v3 = vld [vmem:[%s3705_s15 + $0x98] sm:$0xff] }
  0x65   : > { %2974 = vmatprep.mubr.msk.bf16.mxu0 %vm624_vm1, %v604_v27  ;;  %v851_v7 = vld [vmem:[%s3705_s15 + $0x88] sm:$0xff]  ;;  %v840_v14 = vld [vmem:[%s3705_s15 + $0x30] sm:$0xff]  ;;  %v841_v15 = vld [vmem:[%s3705_s15 + $0x38] sm:$0xff] }
  0x66   : > { %2987 = vmatmul.mubr.msk.bf16.gmra.mrb[4].mxu1 %vm624_vm1, %v611_v32  ;;  %v838_v18 = vld [vmem:[%s3705_s15 + $0x20] sm:$0xff]  ;;  %v839_v19 = vld [vmem:[%s3705_s15 + $0x28] sm:$0xff]  ;;  %v856_v23 = vld [vmem:[%s3705_s15 + $0xb0] sm:$0xff] }
  0x67   : > { %2990 = vmatprep.mubr.msk.bf16.mxu1 %vm624_vm1, %v612_v35  ;;  %v854_v27 = vld [vmem:[%s3705_s15 + $0xa0] sm:$0xff]  ;;  %v857_v31 = vld [vmem:[%s3705_s15 + $0xb8] sm:$0xff]  ;;  %v855_v35 = vld [vmem:[%s3705_s15 + $0xa8] sm:$0xff] }
  0x68   : > { %v844_v42 = vld [vmem:[%s3705_s15 + $0x50] sm:$0xff]  ;;  %v845_v43 = vld [vmem:[%s3705_s15 + $0x58] sm:$0xff]  ;;  %v842_v46 = vld [vmem:[%s3705_s15 + $0x40] sm:$0xff] }
  0x6c   : > { %2975 = vmatmul.mubr.msk.bf16.gmra.mrb[8].mxu0 %vm624_vm1, %v605_v38 }
  0x6d   : > { %2978 = vmatprep.mubr.msk.bf16.mxu0 %vm624_vm1, %v606_v39 }
  0x6e   : > { %2991 = vmatmul.mubr.msk.bf16.gmra.mrb[8].mxu1 %vm624_vm1, %v613_v44 }
  0x6f   : > { %2994 = vmatprep.mubr.msk.bf16.mxu1 %vm624_vm1, %v614_v47  ;;  %v843_v47 = vld [vmem:[%s3705_s15 + $0x48] sm:$0xff] }
  0x74   : > { %2979 = vmatmul.mubr.msk.bf16.gmra.mrb[12].mxu0 %vm624_vm1, %v607_v48 }
  0x76   : > { %2995 = vmatmul.mubr.msk.bf16.gmra.mrb[12].mxu1 %vm624_vm1, %v615_v51  ;;  %v860_v51 = vld [vmem:[%s3705_s15 + $0xd0] sm:$0xff] }
 0x12f   : > { %v2968_v52 = vpop.f32.mrb[0].mxu0 }
 0x130   : > { %v707_v55 = vpop.f32.mrb[1].mxu0  ;;  %v868_v60 = vmul.f32 %v2968_v52, %v836_v53 }
 0x131   : > { %v2969_v58 = vpop.f32.mrb[2].mxu0  ;;  %v866_v0 = vmul.f32 %v834_v56, %v707_v55  ;;  %v2984_v2 = vpop.f32.mrb[0].mxu1  ;;  %v858_v55 = vld [vmem:[%s3705_s15 + $0xc0] sm:$0xff] }
 0x132   : > { %v869_v61 = vmul.f32 %v2969_v58, %v837_v54  ;;  %v710_v62 = vpop.f32.mrb[3].mxu0  ;;  %v3799_v5 = vmul.f32 %v2984_v2, %v852_v59  ;;  %v771_v6 = vpop.f32.mrb[1].mxu1  ;;  %v861_v59 = vld [vmem:[%s3705_s15 + $0xd8] sm:$0xff] }
 0x133   : > { %v867_v1 = vmul.f32 %v835_v57, %v710_v62  ;;  %v3802_v9 = vmul.f32 %v850_v63, %v771_v6  ;;  %v2985_v10 = vpop.f32.mrb[2].mxu1  ;;  %v859_v63 = vld [vmem:[%s3705_s15 + $0xc8] sm:$0xff] }
 0x134   : > { %v899_v4 = vpack.c.bf16 %v869_v61, %v868_v60  ;;  %v3804_v11 = vmul.f32 %v2985_v10, %v853_v3  ;;  %v774_v12 = vpop.f32.mrb[3].mxu1 }
 0x135   : > { %v898_v8 = vpack.c.bf16 %v867_v1, %v866_v0  ;;  %v3809_v16 = vmul.f32 %v851_v7, %v774_v12  ;;  %v848_v7 = vld [vmem:[%s3705_s15 + $0x70] sm:$0xff] }
 0x136   : > { %v907_v20 = vpack.c.bf16 %v3804_v11, %v3799_v5  ;;  %v1140_v5 = vld [vmem:[%s4418_s16] sm:$0x3]  ;;  %v1141_v11 = vstv %s4419_s12 }
 0x137   : > { %v2972_v13 = vpop.f32.mrb[4].mxu0  ;;  %3002 = vmatprep.mubr.msk.bf16.mxu1 %vm930_vm2, %v898_v8  ;;  %v906_v22 = vpack.c.bf16 %v3809_v16, %v3802_v9  ;;  %v849_v8 = vld [vmem:[%s3705_s15 + $0x78] sm:$0xff]  ;;  %v1143_v9 = vlaneseq }
 0x138   : > { %v723_v17 = vpop.f32.mrb[5].mxu0  ;;  %3003 = vmatmul.mubr.msk.bf16.vlgmr.msra.gmra.mrb[16].mxu1 %vm930_vm2, %v899_v4  ;;  %v872_v24 = vmul.f32 %v2972_v13, %v840_v14  ;;  %v846_v13 = vld [vmem:[%s3705_s15 + $0x60] sm:$0xff]  ;;  %v847_v14 = vld [vmem:[%s3705_s15 + $0x68] sm:$0xff] }
 0x139   : > { %v2973_v21 = vpop.f32.mrb[6].mxu0  ;;  %v870_v28 = vmul.f32 %v838_v18, %v723_v17  ;;  %v2988_v30 = vpop.f32.mrb[4].mxu1  ;;  %v3870_v16 = vshrl.u32 %v1143_v9, 7 }
 0x13a   : > { %v873_v25 = vmul.f32 %v2973_v21, %v841_v15  ;;  %v726_v26 = vpop.f32.mrb[7].mxu0  ;;  %v3821_v33 = vmul.f32 %v2988_v30, %v856_v23  ;;  %v787_v34 = vpop.f32.mrb[5].mxu1 }
 0x13b   : > { %v871_v29 = vmul.f32 %v839_v19, %v726_v26  ;;  %v3824_v37 = vmul.f32 %v854_v27, %v787_v34  ;;  %v2989_v38 = vpop.f32.mrb[6].mxu1  ;;  %v864_v19 = vld [vmem:[%s3705_s15 + $0xf0] sm:$0xff] }
 0x13c   : > { %v901_v32 = vpack.c.bf16 %v873_v25, %v872_v24  ;;  %v3826_v39 = vmul.f32 %v2989_v38, %v857_v31  ;;  %v790_v40 = vpop.f32.mrb[7].mxu1  ;;  %v862_v25 = vld [vmem:[%s3705_s15 + $0xe0] sm:$0xff] }
 0x13d   : > { %v900_v36 = vpack.c.bf16 %v871_v29, %v870_v28  ;;  %v3831_v44 = vmul.f32 %v855_v35, %v790_v40  ;;  %v865_v29 = vld [vmem:[%s3705_s15 + $0xf8] sm:$0xff] }
 0x13e   : > { %v909_v48 = vpack.c.bf16 %v3826_v39, %v3821_v33  ;;  %v863_v33 = vld [vmem:[%s3705_s15 + $0xe8] sm:$0xff] }
 0x13f   : > { %v2976_v41 = vpop.f32.mrb[8].mxu0  ;;  %3006 = vmatprep.mubr.msk.bf16.mxu1 %vm930_vm2, %v900_v36  ;;  %v908_v50 = vpack.c.bf16 %v3831_v44, %v3824_v37 }
 0x140   : > { %v739_v45 = vpop.f32.mrb[9].mxu0  ;;  %3007 = vmatmul.mubr.msk.bf16.gmra.mrb[20].mxu1 %vm930_vm2, %v901_v32  ;;  %v876_v52 = vmul.f32 %v2976_v41, %v844_v42  ;;  %v1162_v42 = vsub.s32 0, %v3870_v16 }
 0x141   : > { %v2977_v49 = vpop.f32.mrb[10].mxu0  ;;  %v874_v56 = vmul.f32 %v842_v46, %v739_v45  ;;  %v2992_v58 = vpop.f32.mrb[8].mxu1  ;;  %v3545_v46 = vmov 1.0|1.0  }
 0x142   : > { %v877_v53 = vmul.f32 %v2977_v49, %v845_v43  ;;  %v742_v54 = vpop.f32.mrb[11].mxu0  ;;  %v892_v61 = vmul.f32 %v2992_v58, %v860_v51  ;;  %v803_v62 = vpop.f32.mrb[9].mxu1  ;;  %v1145_v43 = vadd.s32 8, %v3870_v16  ;;  %v1147_v49 = vadd.s32 24, %v3870_v16  ;;  %v1281_v58 = vld [vmem:[#allocation2 + $0x8] sm:$0xff] }
 0x143   : > { %v875_v57 = vmul.f32 %v843_v47, %v742_v54  ;;  %v890_v1 = vmul.f32 %v858_v55, %v803_v62  ;;  %v2993_v2 = vpop.f32.mrb[10].mxu1  ;;  %v4434_v62 = vmov 0 }
 0x144   : > { %v903_v60 = vpack.c.bf16 %v877_v53, %v876_v52  ;;  %v893_v3 = vmul.f32 %v2993_v2, %v861_v59  ;;  %v806_v4 = vpop.f32.mrb[11].mxu1  ;;  %v1148_v52 = vadd.s32 32, %v3870_v16  ;;  %v1149_v53 = vadd.s32 40, %v3870_v16 }
 0x145   : > { %v902_v0 = vpack.c.bf16 %v875_v57, %v874_v56  ;;  %v891_v10 = vmul.f32 %v859_v63, %v806_v4  ;;  %v1150_v56 = vadd.s32 48, %v3870_v16  ;;  %v1151_v57 = vadd.s32 56, %v3870_v16 }
 0x146   : > { %v911_v15 = vpack.c.bf16 %v893_v3, %v892_v61  ;;  %v4432_v59 = vmov 0  ;;  %v1153_v61 = vadd.s32 72, %v3870_v16  ;;  %v4436_v63 = vmov 0 }
 0x147   : > { %v2980_v6 = vpop.f32.mrb[12].mxu0  ;;  %3010 = vmatprep.mubr.msk.bf16.mxu1 %vm930_vm2, %v902_v0  ;;  %v910_v18 = vpack.c.bf16 %v891_v10, %v890_v1  ;;  %v1154_v0 = vadd.s32 80, %v3870_v16  ;;  %v1155_v1 = vadd.s32 88, %v3870_v16  ;;  %v4438_v2 = vmov 0 }
 0x148   : > { %v755_v12 = vpop.f32.mrb[13].mxu0  ;;  %3011 = vmatmul.mubr.msk.bf16.gmra.mrb[24].mxu1 %vm930_vm2, %v903_v60  ;;  %v880_v21 = vmul.f32 %v2980_v6, %v848_v7  ;;  %v1152_v60 = vadd.s32 64, %v3870_v16  ;;  %v4440_v3 = vmov 0  ;;  %v1156_v4 = vadd.s32 96, %v3870_v16  ;;  %v1282_v7 = vld [vmem:[#allocation2 + $0x10] sm:$0xff] }
 0x149   : > { %v2981_v17 = vpop.f32.mrb[14].mxu0  ;;  %v878_v26 = vmul.f32 %v846_v13, %v755_v12  ;;  %v2996_v28 = vpop.f32.mrb[12].mxu1  ;;  %v1157_v6 = vadd.s32 104, %v3870_v16  ;;  %v1158_v10 = vadd.s32 112, %v3870_v16  ;;  %v1159_v12 = vadd.s32 120, %v3870_v16 }
 0x14a   : > { %v881_v23 = vmul.f32 %v2981_v17, %v849_v8  ;;  %v758_v24 = vpop.f32.mrb[15].mxu0  ;;  %v896_v31 = vmul.f32 %v2996_v28, %v864_v19  ;;  %v819_v32 = vpop.f32.mrb[13].mxu1 }
 0x14b   : > { %v879_v27 = vmul.f32 %v847_v14, %v758_v24  ;;  %v894_v35 = vmul.f32 %v862_v25, %v819_v32  ;;  %v2997_v36 = vpop.f32.mrb[14].mxu1  ;;  %v1283_v14 = vld [vmem:[#allocation2 + $0x18] sm:$0xff] }
 0x14c   : > { %v905_v30 = vpack.c.bf16 %v881_v23, %v880_v21  ;;  %v897_v37 = vmul.f32 %v2997_v36, %v865_v29  ;;  %v822_v38 = vpop.f32.mrb[15].mxu1 }
 0x14d   : > { %v904_v34 = vpack.c.bf16 %v879_v27, %v878_v26  ;;  %v895_v39 = vmul.f32 %v863_v33, %v822_v38 }
 0x14e   : > { %v913_v40 = vpack.c.bf16 %v897_v37, %v896_v31 }
 0x14f   : > { %3014 = vmatprep.mubr.msk.bf16.mxu1 %vm930_vm2, %v904_v34  ;;  %v912_v41 = vpack.c.bf16 %v895_v39, %v894_v35 }
 0x150   : > { %3015 = vmatmul.mubr.msk.bf16.gmra.mrb[28].mxu1 %vm930_vm2, %v905_v30 }
 0x151   : > { %3018 = vmatprep.mubr.msk.bf16.mxu1 %vm930_vm2, %v906_v22  ;;  %v1166_v22 = vsub.s32 1, %v3870_v16 }
 0x158   : > { %3019 = vmatmul.mubr.msk.bf16.gmra.mrb[32].mxu1 %vm930_vm2, %v907_v20  ;;  %v1142_v20 = vsub.s32 %v1140_v5, %v1141_v11 }
 0x159   : > { %3022 = vmatprep.mubr.msk.bf16.mxu1 %vm930_vm2, %v908_v50  ;;  %v1280_v50 = vld [vmem:[#allocation2] sm:$0xff] }
 0x15a   : > { %v3882_v44 = vrot.slane %v1142_v20, %v1166_v22  ;;  %v3884_v45 = vrot.slane %v1142_v20, %v1162_v42 }
 0x15c   : > { %vm1169_vm3 = vcmp.eq.s32.totalorder %v3870_v16, %v3882_v44  ;;  %vm1171_vm4 = vcmp.eq.s32.totalorder %v1145_v43, %v3882_v44  ;;  %vm1170_vm5 = vcmp.eq.s32.totalorder %v1145_v43, %v3884_v45  ;;  %vm1168_vm7 = vcmp.eq.s32.totalorder %v3870_v16, %v3884_v45 }
 0x15d   : > { %vm2584_vm6 = vmpackc.low %vm1171_vm4, %vm1169_vm3  ;;  %vm1175_vm10 = vcmp.eq.s32.totalorder %v1147_v49, %v3882_v44  ;;  %vm1174_vm12 = vcmp.eq.s32.totalorder %v1147_v49, %v3884_v45  ;;  %vm1177_vm15 = vcmp.eq.s32.totalorder %v1148_v52, %v3882_v44  ;;  %vm1179_vm0 = vcmp.eq.s32.totalorder %v1149_v53, %v3882_v44 }
 0x15e   : > { %2585 = vmatprep.mubr.msk.bf16.mxu0 %vm2584_vm6, %v3545_v46  ;;  %vm3893_vm8 = vmpackc.low %vm1170_vm5, %vm1168_vm7  ;;  %vm1176_vm1 = vcmp.eq.s32.totalorder %v1148_v52, %v3884_v45  ;;  %vm1181_vm5 = vcmp.eq.s32.totalorder %v1150_v56, %v3882_v44  ;;  %vm1183_vm6 = vcmp.eq.s32.totalorder %v1151_v57, %v3882_v44  ;;  %vm1180_vm7 = vcmp.eq.s32.totalorder %v1150_v56, %v3884_v45 }
 0x15f   : > { %vm3917_vm3 = vmpackc.low %vm1179_vm0, %vm1177_vm15  ;;  %vm1187_vm15 = vcmp.eq.s32.totalorder %v1153_v61, %v3882_v44  ;;  %vm1184_vm0 = vcmp.eq.s32.totalorder %v1152_v60, %v3884_v45 }
 0x160   : > { %3023 = vmatmul.mubr.msk.bf16.gmra.mrb[36].mxu1 %vm930_vm2, %v909_v48  ;;  %v1146_v48 = vadd.s32 16, %v3870_v16 }
 0x161   : > { %3026 = vmatprep.mubr.msk.bf16.mxu1 %vm930_vm2, %v910_v18 }
 0x162   : > { %vm1173_vm9 = vcmp.eq.s32.totalorder %v1146_v48, %v3882_v44  ;;  %vm1172_vm11 = vcmp.eq.s32.totalorder %v1146_v48, %v3884_v45 }
 0x163   : > { %vm3903_vm13 = vmpackc.low %vm1175_vm10, %vm1173_vm9  ;;  %vm1182_vm9 = vcmp.eq.s32.totalorder %v1151_v57, %v3884_v45 }
 0x164   : > { %vm3907_vm14 = vmpackc.low %vm1174_vm12, %vm1172_vm11  ;;  %vm1185_vm12 = vcmp.eq.s32.totalorder %v1152_v60, %v3882_v44 }
 0x165   : > { %vm3931_vm10 = vmpackc.low %vm1183_vm6, %vm1181_vm5  ;;  %vm1189_vm6 = vcmp.eq.s32.totalorder %v1154_v0, %v3882_v44 }
 0x166   : > { %vm3935_vm11 = vmpackc.low %vm1182_vm9, %vm1180_vm7  ;;  %vm1191_vm7 = vcmp.eq.s32.totalorder %v1155_v1, %v3882_v44  ;;  %vm1188_vm9 = vcmp.eq.s32.totalorder %v1154_v0, %v3884_v45 }
 0x167   : > { %v4433_v59 = vsel %vm3935_vm11, 4294967295, %v4432_v59  ;;  %vm1190_vm11 = vcmp.eq.s32.totalorder %v1155_v1, %v3884_v45 }
 0x168   : > { %3027 = vmatmul.mubr.msk.bf16.gmra.mrb[40].mxu1 %vm930_vm2, %v911_v15 }
 0x169   : > { %3030 = vmatprep.mubr.msk.bf16.mxu1 %vm930_vm2, %v912_v41 }
 0x170   : > { %3031 = vmatmul.mubr.msk.bf16.gmra.mrb[44].mxu1 %vm930_vm2, %v913_v40  ;;  %vm1178_vm2 = vcmp.eq.s32.totalorder %v1149_v53, %v3884_v45 }
 0x171   : > { %vm3921_vm4 = vmpackc.low %vm1178_vm2, %vm1176_vm1  ;;  %vm1186_vm1 = vcmp.eq.s32.totalorder %v1153_v61, %v3884_v45 }
 0x172   : > { %vm3945_vm2 = vmpackc.low %vm1187_vm15, %vm1185_vm12 }
 0x173   : > { %v4435_v62 = vsel %vm3945_vm2, 4294967295, %v4434_v62  ;;  %vm3949_vm5 = vmpackc.low %vm1186_vm1, %vm1184_vm0  ;;  %vm1193_vm0 = vcmp.eq.s32.totalorder %v1156_v4, %v3882_v44  ;;  %vm1195_vm1 = vcmp.eq.s32.totalorder %v1157_v6, %v3882_v44  ;;  %vm1194_vm2 = vcmp.eq.s32.totalorder %v1157_v6, %v3884_v45 }
 0x174   : > { %v4437_v63 = vsel %vm3949_vm5, 4294967295, %v4436_v63  ;;  %vm3959_vm12 = vmpackc.low %vm1191_vm7, %vm1189_vm6  ;;  %vm1192_vm5 = vcmp.eq.s32.totalorder %v1156_v4, %v3884_v45  ;;  %vm1197_vm7 = vcmp.eq.s32.totalorder %v1158_v10, %v3882_v44 }
 0x175   : > { %v4439_v2 = vsel %vm3959_vm12, 4294967295, %v4438_v2  ;;  %vm3963_vm15 = vmpackc.low %vm1190_vm11, %vm1188_vm9  ;;  %vm1199_vm9 = vcmp.eq.s32.totalorder %v1159_v12, %v3882_v44  ;;  %vm1198_vm12 = vcmp.eq.s32.totalorder %v1159_v12, %v3884_v45 }
 0x176   : > { %v4441_v3 = vsel %vm3963_vm15, 4294967295, %v4440_v3  ;;  %vm3973_vm6 = vmpackc.low %vm1195_vm1, %vm1193_vm0  ;;  %vm1196_vm15 = vcmp.eq.s32.totalorder %v1158_v10, %v3884_v45 }
 0x177   : > { %vm3977_vm11 = vmpackc.low %vm1194_vm2, %vm1192_vm5 }
 0x178   : > { %vm3987_vm0 = vmpackc.low %vm1199_vm9, %vm1197_vm7 }
 0x179   : > { %vm3991_vm2 = vmpackc.low %vm1198_vm12, %vm1196_vm15 }
 0x20b   : > { %v3004_v15 = vpop.f32.mrb[16].mxu1 }
 0x20c   : > { %v1013_v17 = vpop.f32.mrb[17].mxu1 }
 0x20d   : > { %v3005_v18 = vpop.f32.mrb[18].mxu1 }
 0x20e   : > { %v1297_v19 = vpack.c.bf16 %v3005_v18, %v3004_v15  ;;  %v1016_v21 = vpop.f32.mrb[19].mxu1 }
 0x20f   : > { %v1296_v23 = vpack.c.bf16 %v1016_v21, %v1013_v17 }
 0x213   : > { %v3008_v24 = vpop.f32.mrb[20].mxu1 }
 0x214   : > { %v1029_v25 = vpop.f32.mrb[21].mxu1 }
 0x215   : > { %v3009_v26 = vpop.f32.mrb[22].mxu1 }
 0x216   : > { %v1299_v27 = vpack.c.bf16 %v3009_v26, %v3008_v24  ;;  %v1032_v28 = vpop.f32.mrb[23].mxu1 }
 0x217   : > { %v1298_v29 = vpack.c.bf16 %v1032_v28, %v1029_v25 }
 0x21b   : > { %v3012_v30 = vpop.f32.mrb[24].mxu1 }
 0x21c   : > { %v1045_v31 = vpop.f32.mrb[25].mxu1 }
 0x21d   : > { %v3013_v32 = vpop.f32.mrb[26].mxu1 }
 0x21e   : > { %v1301_v33 = vpack.c.bf16 %v3013_v32, %v3012_v30  ;;  %v1048_v34 = vpop.f32.mrb[27].mxu1 }
 0x21f   : > { %v1300_v35 = vpack.c.bf16 %v1048_v34, %v1045_v31 }
 0x223   : > { %v3016_v36 = vpop.f32.mrb[28].mxu1 }
 0x224   : > { %v1061_v37 = vpop.f32.mrb[29].mxu1 }
 0x225   : > { %v3017_v38 = vpop.f32.mrb[30].mxu1 }
 0x226   : > { %v1303_v39 = vpack.c.bf16 %v3017_v38, %v3016_v36  ;;  %v1064_v40 = vpop.f32.mrb[31].mxu1 }
 0x227   : > { %v1302_v41 = vpack.c.bf16 %v1064_v40, %v1061_v37  ;;  %v1287_v37 = vld [vmem:[#allocation2 + $0x38] sm:$0xff] }
 0x22b   : > { %v3020_v9 = vpop.f32.mrb[32].mxu1 }
 0x22c   : > { %v1077_v16 = vpop.f32.mrb[33].mxu1 }
 0x22d   : > { %v3021_v5 = vpop.f32.mrb[34].mxu1 }
 0x22e   : > { %v1305_v11 = vpack.c.bf16 %v3021_v5, %v3020_v9  ;;  %v1080_v20 = vpop.f32.mrb[35].mxu1 }
 0x22f   : > { %v1304_v22 = vpack.c.bf16 %v1080_v20, %v1077_v16  ;;  %v1288_v16 = vld [vmem:[#allocation2 + $0x40] sm:$0xff] }
 0x231   : > { %2828 = vmatprep.subr.bf16.mxu0 %v1304_v22  ;;  %v1289_v22 = vld [vmem:[#allocation2 + $0x48] sm:$0xff] }
 0x232   : > { %2829 = vmatpush3.bf16.msra.mxu0 %v1296_v23  ;;  %v1284_v23 = vld [vmem:[#allocation2 + $0x20] sm:$0xff] }
 0x233   : > { %v3024_v42 = vpop.f32.mrb[36].mxu1  ;;  %2830 = vmatprep.subr.bf16.mxu0 %v1305_v11 }
 0x234   : > { %v1093_v43 = vpop.f32.mrb[37].mxu1 }
 0x235   : > { %v3025_v44 = vpop.f32.mrb[38].mxu1 }
 0x236   : > { %v1307_v45 = vpack.c.bf16 %v3025_v44, %v3024_v42  ;;  %v1096_v48 = vpop.f32.mrb[39].mxu1  ;;  %2831 = vmatpush3.bf16.msra.mxu0 %v1297_v19 }
 0x237   : > { %v1306_v49 = vpack.c.bf16 %v1096_v48, %v1093_v43 }
 0x239   : > { %2832 = vmatprep.subr.bf16.mxu0 %v1306_v49  ;;  %v1290_v49 = vld [vmem:[#allocation2 + $0x50] sm:$0xff] }
 0x23a   : > { %2833 = vmatpush3.bf16.msra.mxu0 %v1298_v29 }
 0x23b   : > { %v3028_v52 = vpop.f32.mrb[40].mxu1  ;;  %2834 = vmatprep.subr.bf16.mxu0 %v1307_v45 }
 0x23c   : > { %v1109_v53 = vpop.f32.mrb[41].mxu1 }
 0x23d   : > { %v3029_v56 = vpop.f32.mrb[42].mxu1 }
 0x23e   : > { %v1309_v57 = vpack.c.bf16 %v3029_v56, %v3028_v52  ;;  %v1112_v60 = vpop.f32.mrb[43].mxu1  ;;  %2835 = vmatpush3.bf16.msra.mxu0 %v1299_v27  ;;  %v1285_v27 = vld [vmem:[#allocation2 + $0x28] sm:$0xff] }
 0x23f   : > { %v1308_v61 = vpack.c.bf16 %v1112_v60, %v1109_v53 }
 0x241   : > { %2836 = vmatprep.subr.bf16.mxu0 %v1308_v61 }
 0x242   : > { %2837 = vmatpush3.bf16.msra.mxu0 %v1300_v35 }
 0x243   : > { %v3032_v0 = vpop.f32.mrb[44].mxu1  ;;  %2838 = vmatprep.subr.bf16.mxu0 %v1309_v57  ;;  %v1291_v57 = vld [vmem:[#allocation2 + $0x58] sm:$0xff] }
 0x244   : > { %v1125_v1 = vpop.f32.mrb[45].mxu1 }
 0x245   : > { %v3033_v4 = vpop.f32.mrb[46].mxu1 }
 0x246   : > { %v1311_v6 = vpack.c.bf16 %v3033_v4, %v3032_v0  ;;  %v1128_v10 = vpop.f32.mrb[47].mxu1  ;;  %2839 = vmatpush3.bf16.msra.mxu0 %v1301_v33  ;;  %v1286_v33 = vld [vmem:[#allocation2 + $0x30] sm:$0xff] }
 0x247   : > { %v1310_v12 = vpack.c.bf16 %v1128_v10, %v1125_v1 }
 0x249   : > { %2840 = vmatprep.subr.bf16.mxu0 %v1310_v12 }
 0x24a   : > { %2841 = vmatpush3.bf16.msra.mxu0 %v1302_v41 }
 0x24b   : > { %2842 = vmatprep.subr.bf16.mxu0 %v1311_v6  ;;  %v1292_v6 = vld [vmem:[#allocation2 + $0x60] sm:$0xff] }
 0x24e   : > { %2843 = vmatpush3.bf16.msra.mxu0 %v1303_v39 }
 0x251   : > { %2587 = vmatmul.mubr.msk.bf16.vlgmr.msra.gmra.mrb[16].mxu0 %vm3893_vm8, %v3545_v46  ;;  %vm4450_vm8 = vnez %v4433_v59 }
 0x252   : > { %2589 = vmatprep.mubr.msk.bf16.mxu0 %vm3903_vm13, %v3545_v46  ;;  %vm4451_vm13 = vnez %v4435_v62 }
 0x259   : > { %2591 = vmatmul.mubr.msk.bf16.gmra.mrb[20].mxu0 %vm3907_vm14, %v3545_v46  ;;  %vm4452_vm14 = vnez %v4437_v63 }
 0x25a   : > { %2593 = vmatprep.mubr.msk.bf16.mxu0 %vm3917_vm3, %v3545_v46  ;;  %vm4453_vm3 = vnez %v4439_v2 }
 0x261   : > { %2595 = vmatmul.mubr.msk.bf16.gmra.mrb[24].mxu0 %vm3921_vm4, %v3545_v46  ;;  %vm4454_vm4 = vnez %v4441_v3 }
 0x262   : > { %2597 = vmatprep.mubr.msk.bf16.mxu0 %vm3931_vm10, %v3545_v46  ;;  %vm1425_vm10 = vcmask 523264  }
 0x269   : > { %2599 = vmatmul.mubr.msk.bf16.gmra.mrb[28].mxu0 %vm4450_vm8, %v3545_v46 }
 0x26a   : > { %2601 = vmatprep.mubr.msk.bf16.mxu0 %vm4451_vm13, %v3545_v46 }
 0x271   : > { %2603 = vmatmul.mubr.msk.bf16.gmra.mrb[32].mxu0 %vm4452_vm14, %v3545_v46 }
 0x272   : > { %2605 = vmatprep.mubr.msk.bf16.mxu0 %vm4453_vm3, %v3545_v46 }
 0x279   : > { %2607 = vmatmul.mubr.msk.bf16.gmra.mrb[36].mxu0 %vm4454_vm4, %v3545_v46 }
 0x27a   : > { %2609 = vmatprep.mubr.msk.bf16.mxu0 %vm3973_vm6, %v3545_v46 }
 0x281   : > { %2611 = vmatmul.mubr.msk.bf16.gmra.mrb[40].mxu0 %vm3977_vm11, %v3545_v46 }
 0x282   : > { %2613 = vmatprep.mubr.msk.bf16.mxu0 %vm3987_vm0, %v3545_v46 }
 0x289   : > { %2615 = vmatmul.mubr.msk.bf16.gmra.mrb[44].mxu0 %vm3991_vm2, %v3545_v46 }
 0x324   : > { %v2844_v47 = vpop.f32.mrb[16].mxu0 }
 0x325   : > { %v2845_v51 = vpop.f32.mrb[17].mxu0 }
 0x326   : > { %v2846_v54 = vadd.f32 %v2845_v51, %v2844_v47  ;;  %v2847_v55 = vpop.f32.mrb[18].mxu0 }
 0x327   : > { %v2848_v59 = vpop.f32.mrb[19].mxu0 }
 0x328   : > { %v1409_v62 = vadd.f32 %v2846_v54, %v1280_v50  ;;  %v2849_v63 = vadd.f32 %v2848_v59, %v2847_v55  ;;  %v1293_v50 = vld [vmem:[#allocation2 + $0x68] sm:$0xff] }
 0x32a   : > { %1426 = vst.msk [vmem:[#allocation2] sm:$0xff] %vm1425_vm10, %v1409_v62  ;;  %v1410_v2 = vadd.f32 %v2849_v63, %v1281_v58  ;;  %v1294_v62 = vld [vmem:[#allocation2 + $0x70] sm:$0xff] }
 0x32c   : > { %1427 = vst.msk [vmem:[#allocation2 + $0x8] sm:$0xff] %vm1425_vm10, %v1410_v2  ;;  %v2850_v3 = vpop.f32.mrb[20].mxu0 }
 0x32d   : > { %v2851_v8 = vpop.f32.mrb[21].mxu0 }
 0x32e   : > { %v2852_v13 = vadd.f32 %v2851_v8, %v2850_v3  ;;  %v2853_v46 = vpop.f32.mrb[22].mxu0 }
 0x32f   : > { %v2854_v15 = vpop.f32.mrb[23].mxu0 }
 0x330   : > { %v1411_v17 = vadd.f32 %v2852_v13, %v1282_v7  ;;  %v2855_v18 = vadd.f32 %v2854_v15, %v2853_v46  ;;  %v1295_v7 = vld [vmem:[#allocation2 + $0x78] sm:$0xff] }
 0x332   : > { %1428 = vst.msk [vmem:[#allocation2 + $0x10] sm:$0xff] %vm1425_vm10, %v1411_v17  ;;  %v1412_v19 = vadd.f32 %v2855_v18, %v1283_v14 }
 0x334   : > { %1429 = vst.msk [vmem:[#allocation2 + $0x18] sm:$0xff] %vm1425_vm10, %v1412_v19  ;;  %v2856_v21 = vpop.f32.mrb[24].mxu0 }
 0x335   : > { %v2857_v24 = vpop.f32.mrb[25].mxu0 }
 0x336   : > { %v2858_v25 = vadd.f32 %v2857_v24, %v2856_v21  ;;  %v2859_v26 = vpop.f32.mrb[26].mxu0 }
 0x337   : > { %v2860_v28 = vpop.f32.mrb[27].mxu0 }
 0x338   : > { %v1413_v29 = vadd.f32 %v2858_v25, %v1284_v23  ;;  %v2861_v30 = vadd.f32 %v2860_v28, %v2859_v26 }
 0x33a   : > { %1430 = vst.msk [vmem:[#allocation2 + $0x20] sm:$0xff] %vm1425_vm10, %v1413_v29  ;;  %v1414_v31 = vadd.f32 %v2861_v30, %v1285_v27 }
 0x33c   : > { %1431 = vst.msk [vmem:[#allocation2 + $0x28] sm:$0xff] %vm1425_vm10, %v1414_v31  ;;  %v2862_v32 = vpop.f32.mrb[28].mxu0 }
 0x33d   : > { %v2863_v34 = vpop.f32.mrb[29].mxu0 }
 0x33e   : > { %v2864_v35 = vadd.f32 %v2863_v34, %v2862_v32  ;;  %v2865_v36 = vpop.f32.mrb[30].mxu0 }
 0x33f   : > { %v2866_v38 = vpop.f32.mrb[31].mxu0 }
 0x340   : > { %v1415_v39 = vadd.f32 %v2864_v35, %v1286_v33  ;;  %v2867_v40 = vadd.f32 %v2866_v38, %v2865_v36 }
 0x342   : > { %1432 = vst.msk [vmem:[#allocation2 + $0x30] sm:$0xff] %vm1425_vm10, %v1415_v39  ;;  %v1416_v41 = vadd.f32 %v2867_v40, %v1287_v37 }
 0x344   : > { %1433 = vst.msk [vmem:[#allocation2 + $0x38] sm:$0xff] %vm1425_vm10, %v1416_v41  ;;  %v2868_v9 = vpop.f32.mrb[32].mxu0 }
 0x345   : > { %v2869_v5 = vpop.f32.mrb[33].mxu0 }
 0x346   : > { %v2870_v11 = vadd.f32 %v2869_v5, %v2868_v9  ;;  %v2871_v20 = vpop.f32.mrb[34].mxu0 }
 0x347   : > { %v2872_v42 = vpop.f32.mrb[35].mxu0 }
 0x348   : > { %v1417_v43 = vadd.f32 %v2870_v11, %v1288_v16  ;;  %v2873_v44 = vadd.f32 %v2872_v42, %v2871_v20 }
 0x34a   : > { %1434 = vst.msk [vmem:[#allocation2 + $0x40] sm:$0xff] %vm1425_vm10, %v1417_v43  ;;  %v1418_v45 = vadd.f32 %v2873_v44, %v1289_v22 }
 0x34c   : > { %1435 = vst.msk [vmem:[#allocation2 + $0x48] sm:$0xff] %vm1425_vm10, %v1418_v45  ;;  %v2874_v48 = vpop.f32.mrb[36].mxu0 }
 0x34d   : > { %v2875_v52 = vpop.f32.mrb[37].mxu0 }
 0x34e   : > { %v2876_v53 = vadd.f32 %v2875_v52, %v2874_v48  ;;  %v2877_v56 = vpop.f32.mrb[38].mxu0 }
 0x34f   : > { %v2878_v60 = vpop.f32.mrb[39].mxu0 }
 0x350   : > { %v1419_v61 = vadd.f32 %v2876_v53, %v1290_v49  ;;  %v2879_v0 = vadd.f32 %v2878_v60, %v2877_v56 }
 0x352   : > { %1436 = vst.msk [vmem:[#allocation2 + $0x50] sm:$0xff] %vm1425_vm10, %v1419_v61  ;;  %v1420_v1 = vadd.f32 %v2879_v0, %v1291_v57 }
 0x354   : > { %1437 = vst.msk [vmem:[#allocation2 + $0x58] sm:$0xff] %vm1425_vm10, %v1420_v1  ;;  %v2880_v4 = vpop.f32.mrb[40].mxu0 }
 0x355   : > { %v2881_v10 = vpop.f32.mrb[41].mxu0 }
 0x356   : > { %v2882_v12 = vadd.f32 %v2881_v10, %v2880_v4  ;;  %v2883_v47 = vpop.f32.mrb[42].mxu0 }
 0x357   : > { %v2884_v51 = vpop.f32.mrb[43].mxu0 }
 0x358   : > { %v1421_v54 = vadd.f32 %v2882_v12, %v1292_v6  ;;  %v2885_v55 = vadd.f32 %v2884_v51, %v2883_v47 }
 0x35a   : > { %1438 = vst.msk [vmem:[#allocation2 + $0x60] sm:$0xff] %vm1425_vm10, %v1421_v54  ;;  %v1422_v58 = vadd.f32 %v2885_v55, %v1293_v50 }
 0x35c   : > { %1439 = vst.msk [vmem:[#allocation2 + $0x68] sm:$0xff] %vm1425_vm10, %v1422_v58  ;;  %v2886_v59 = vpop.f32.mrb[44].mxu0 }
 0x35d   : > { %v2887_v63 = vpop.f32.mrb[45].mxu0 }
 0x35e   : > { %v2888_v2 = vadd.f32 %v2887_v63, %v2886_v59  ;;  %v2889_v3 = vpop.f32.mrb[46].mxu0 }
 0x35f   : > { %v2890_v8 = vpop.f32.mrb[47].mxu0 }
 0x360   : > { %v1423_v13 = vadd.f32 %v2888_v2, %v1294_v62  ;;  %v2891_v46 = vadd.f32 %v2890_v8, %v2889_v3 }
 0x362   : > { %1440 = vst.msk [vmem:[#allocation2 + $0x70] sm:$0xff] %vm1425_vm10, %v1423_v13  ;;  %v1424_v14 = vadd.f32 %v2891_v46, %v1295_v7 }
 0x364   : > { %1441 = vst.msk [vmem:[#allocation2 + $0x78] sm:$0xff] %vm1425_vm10, %v1424_v14 }
 0x365 PF: > { %p2616_p7 = scmp.ne.s32.totalorder %s3524_s24, 1 }
 0x366   : > { %v1462_v15 = vld [vmem:[%s4396_s7] sm:$0xff] (!%p2616_p7)  ;;  %v1463_v17 = vld [vmem:[%s4396_s7 + $0x8] sm:$0xff] (!%p2616_p7)  ;;  %v1464_v18 = vld [vmem:[%s4396_s7 + $0x10] sm:$0xff] (!%p2616_p7)  ;;  %vm1477_vm5 = vcmask (!%p2616_p7), 523264  }
 0x367   : > { %1445 = sbr.rel (%p2616_p7) target bundleno = 1635 (0x663), region = 64  ;;  %v3154_v19 = vpack.c.bf16 (!%p2616_p7), %v1463_v17, %v1462_v15  ;;  %v1465_v21 = vld [vmem:[%s4396_s7 + $0x18] sm:$0xff] (!%p2616_p7)  ;;  %v1466_v24 = vld [vmem:[%s4396_s7 + $0x20] sm:$0xff] (!%p2616_p7)  ;;  %v1467_v25 = vld [vmem:[%s4396_s7 + $0x28] sm:$0xff] (!%p2616_p7) }
 0x368   : > { %v3158_v23 = vpack.c.bf16 (!%p2616_p7), %v1465_v21, %v1464_v18  ;;  %v1446_v26 = vld [vmem:[#allocation2] sm:$0xff] (!%p2616_p7)  ;;  %v3162_v28 = vpack.c.bf16 (!%p2616_p7), %v1467_v25, %v1466_v24  ;;  %v1468_v29 = vld [vmem:[%s4396_s7 + $0x30] sm:$0xff] (!%p2616_p7)  ;;  %v1469_v30 = vld [vmem:[%s4396_s7 + $0x38] sm:$0xff] (!%p2616_p7) }
 0x369   : > { %3155 = vmatprep.subr.bf16.mxu0 (!%p2616_p7), %v3154_v19  ;;  %3204 = vmatprep.subr.bf16.mxu1 (!%p2616_p7), %v3154_v19  ;;  %v1454_v27 = vld [vmem:[#allocation2 + $0x40] sm:$0xff] (!%p2616_p7)  ;;  %v3166_v31 = vpack.c.bf16 (!%p2616_p7), %v1469_v30, %v1468_v29  ;;  %v1447_v32 = vld [vmem:[#allocation2 + $0x8] sm:$0xff] (!%p2616_p7)  ;;  %v1448_v34 = vld [vmem:[#allocation2 + $0x10] sm:$0xff] (!%p2616_p7) }
 0x36a   : > { %3157 = vmatpush3.bf16.msra.mxu0 (!%p2616_p7), %v3154_v19  ;;  %3208 = vmatpush3.bf16.msra.mxu1 (!%p2616_p7), %v3154_v19  ;;  %v1455_v33 = vld [vmem:[#allocation2 + $0x48] sm:$0xff] (!%p2616_p7)  ;;  %v1456_v35 = vld [vmem:[#allocation2 + $0x50] sm:$0xff] (!%p2616_p7)  ;;  %v1449_v36 = vld [vmem:[#allocation2 + $0x18] sm:$0xff] (!%p2616_p7) }
 0x36b   : > { %3159 = vmatprep.subr.bf16.mxu0 (!%p2616_p7), %v3158_v23  ;;  %3205 = vmatprep.subr.bf16.mxu1 (!%p2616_p7), %v3158_v23  ;;  %v1457_v37 = vld [vmem:[#allocation2 + $0x58] sm:$0xff] (!%p2616_p7)  ;;  %v1450_v38 = vld [vmem:[#allocation2 + $0x20] sm:$0xff] (!%p2616_p7)  ;;  %v1451_v40 = vld [vmem:[#allocation2 + $0x28] sm:$0xff] (!%p2616_p7) }
 0x36c   : > { %3050 = vmatprep.mubr.msk.f32.mxu0 (!%p2616_p7), %vm1477_vm5, %v1446_v26  ;;  %3062 = vmatprep.mubr.msk.f32.mxu1 (!%p2616_p7), %vm1477_vm5, %v1454_v27  ;;  %v1458_v39 = vld [vmem:[#allocation2 + $0x60] sm:$0xff] (!%p2616_p7)  ;;  %v1459_v41 = vld [vmem:[#allocation2 + $0x68] sm:$0xff] (!%p2616_p7)  ;;  %v1452_v9 = vld [vmem:[#allocation2 + $0x30] sm:$0xff] (!%p2616_p7) }
 0x36d   : > { %v1460_v16 = vld [vmem:[#allocation2 + $0x70] sm:$0xff] (!%p2616_p7)  ;;  %v1453_v5 = vld [vmem:[#allocation2 + $0x38] sm:$0xff] (!%p2616_p7)  ;;  %v2650_v20 = vld [vmem:[%s4396_s7 + $0x40] sm:$0xff] (!%p2616_p7) }
 0x36e   : > { %3161 = vmatpush3.bf16.msra.mxu0 %v3158_v23  ;;  %3209 = vmatpush3.bf16.msra.mxu1 %v3158_v23  ;;  %v1461_v11 = vld [vmem:[#allocation2 + $0x78] sm:$0xff]  ;;  %v2651_v22 = vld [vmem:[%s4396_s7 + $0x48] sm:$0xff]  ;;  %v2652_v43 = vld [vmem:[%s4396_s7 + $0x50] sm:$0xff] }
 0x36f   : > { %3163 = vmatprep.subr.bf16.mxu0 %v3162_v28  ;;  %3206 = vmatprep.subr.bf16.mxu1 %v3162_v28  ;;  %v3170_v42 = vpack.c.bf16 %v2651_v22, %v2650_v20  ;;  %v2653_v44 = vld [vmem:[%s4396_s7 + $0x58] sm:$0xff]  ;;  %v2654_v48 = vld [vmem:[%s4396_s7 + $0x60] sm:$0xff]  ;;  %v2655_v49 = vld [vmem:[%s4396_s7 + $0x68] sm:$0xff] }
 0x370   : > { %v3174_v45 = vpack.c.bf16 %v2653_v44, %v2652_v43  ;;  %v3178_v52 = vpack.c.bf16 %v2655_v49, %v2654_v48  ;;  %v2656_v53 = vld [vmem:[%s4396_s7 + $0x70] sm:$0xff]  ;;  %v2657_v56 = vld [vmem:[%s4396_s7 + $0x78] sm:$0xff]  ;;  %v4124_v60 = vld [vmem:[%s4397_s8] ss:$0 sm:$0xff] }
 0x371   : > { %v3182_v57 = vpack.c.bf16 %v2657_v56, %v2656_v53 }
 0x372   : > { %3165 = vmatpush3.bf16.msra.mxu0 %v3162_v28  ;;  %3210 = vmatpush3.bf16.msra.mxu1 %v3162_v28 }
 0x373   : > { %3167 = vmatprep.subr.bf16.mxu0 %v3166_v31  ;;  %3207 = vmatprep.subr.bf16.mxu1 %v3166_v31 }
 0x376   : > { %3169 = vmatpush3.bf16.msra.mxu0 %v3166_v31  ;;  %3211 = vmatpush3.bf16.msra.mxu1 %v3166_v31 }
 0x377   : > { %3171 = vmatprep.subr.bf16.mxu1 %v3170_v42 }
 0x379   : > { %3051 = vmatmul.mubr.msk.f32.vlgmr.msra.gmra.mrb[0].mxu0 %vm1477_vm5, %v1447_v32  ;;  %3063 = vmatmul.mubr.msk.f32.vlgmr.msra.gmra.mrb[0].mxu1 %vm1477_vm5, %v1455_v33 }
 0x37a   : > { %3053 = vmatprep.mubr.msk.f32.mxu0 %vm1477_vm5, %v1448_v34  ;;  %3065 = vmatprep.mubr.msk.f32.mxu1 %vm1477_vm5, %v1456_v35 }
 0x37b   : > { %3173 = vmatpush3.bf16.msra.mxu1 %v3170_v42 }
 0x37c   : > { %3175 = vmatprep.subr.bf16.mxu1 %v3174_v45 }
 0x37d   : > { %3054 = vmatmul.mubr.msk.f32.gmra.mrb[2].mxu0 %vm1477_vm5, %v1449_v36  ;;  %3066 = vmatmul.mubr.msk.f32.gmra.mrb[2].mxu1 %vm1477_vm5, %v1457_v37 }
 0x37e   : > { %3056 = vmatprep.mubr.msk.f32.mxu0 %vm1477_vm5, %v1450_v38  ;;  %3068 = vmatprep.mubr.msk.f32.mxu1 %vm1477_vm5, %v1458_v39 }
 0x37f   : > { %3177 = vmatpush3.bf16.msra.mxu1 %v3174_v45 }
 0x380   : > { %3179 = vmatprep.subr.bf16.mxu1 %v3178_v52 }
 0x381   : > { %3057 = vmatmul.mubr.msk.f32.gmra.mrb[4].mxu0 %vm1477_vm5, %v1451_v40  ;;  %3069 = vmatmul.mubr.msk.f32.gmra.mrb[4].mxu1 %vm1477_vm5, %v1459_v41 }
 0x382   : > { %3059 = vmatprep.mubr.msk.f32.mxu0 %vm1477_vm5, %v1452_v9  ;;  %3071 = vmatprep.mubr.msk.f32.mxu1 %vm1477_vm5, %v1460_v16 }
 0x383   : > { %3181 = vmatpush3.bf16.msra.mxu1 %v3178_v52 }
 0x384   : > { %3183 = vmatprep.subr.bf16.mxu1 %v3182_v57 }
 0x385   : > { %3060 = vmatmul.mubr.msk.f32.gmra.mrb[6].mxu0 %vm1477_vm5, %v1453_v5  ;;  %3072 = vmatmul.mubr.msk.f32.gmra.mrb[6].mxu1 %vm1477_vm5, %v1461_v11 }
 0x387   : > { %3185 = vmatpush3.bf16.msra.mxu1 %v3182_v57 }
 0x44c   : > { %v3052_v61 = vpop.f32.mrb[0].mxu0  ;;  %v3064_v0 = vpop.f32.mrb[0].mxu1 }
 0x44d   : > { %v4127_v1 = vadd.f32 %v3052_v61, %v4124_v60  ;;  %v1592_v4 = vpop.f32.mrb[1].mxu0  ;;  %v1632_v6 = vpop.f32.mrb[1].mxu1  ;;  %v4158_v33 = vadd.f32 %v3064_v0, %v4124_v60 }
 0x44e   : > { %v4130_v10 = vadd.f32 %v4124_v60, %v1592_v4  ;;  %v4151_v26 = vadd.f32 %v4124_v60, %v1632_v6 }
 0x44f   : > { %v2635_v12 = vmul.f32 -1.442695, %v4127_v1  ;;  %v2643_v41 = vmul.f32 -1.442695, %v4158_v33 }
 0x450   : > { %v2634_v47 = vmul.f32 -1.442695, %v4130_v10  ;;  %v3055_v50 = vpop.f32.mrb[2].mxu0  ;;  %v3067_v51 = vpop.f32.mrb[2].mxu1  ;;  %v2642_v32 = vmul.f32 -1.442695, %v4151_v26 }
 0x451   : > { %3292 = vpow2.f32 %v2635_v12  ;;  %v4135_v54 = vadd.f32 %v3055_v50, %v4124_v60  ;;  %v1602_v55 = vpop.f32.mrb[3].mxu0  ;;  %v1642_v58 = vpop.f32.mrb[3].mxu1  ;;  %v4169_v16 = vadd.f32 %v3067_v51, %v4124_v60 }
 0x452   : > { %v4138_v59 = vadd.f32 %v4124_v60, %v1602_v55  ;;  %3294 = vpow2.f32 %v2634_v47  ;;  %v4162_v37 = vadd.f32 %v4124_v60, %v1642_v58 }
 0x453   : > { %v2637_v62 = vmul.f32 -1.442695, %v4135_v54  ;;  %v2645_v44 = vmul.f32 -1.442695, %v4169_v16 }
 0x454   : > { %v2636_v63 = vmul.f32 -1.442695, %v4138_v59  ;;  %v3058_v2 = vpop.f32.mrb[4].mxu0  ;;  %v3070_v3 = vpop.f32.mrb[4].mxu1  ;;  %v2644_v5 = vmul.f32 -1.442695, %v4162_v37 }
 0x455   : > { %3296 = vpow2.f32 %v2637_v62  ;;  %v4143_v7 = vadd.f32 %v3058_v2, %v4124_v60  ;;  %v1612_v8 = vpop.f32.mrb[5].mxu0  ;;  %v1652_v13 = vpop.f32.mrb[5].mxu1  ;;  %v4179_v45 = vadd.f32 %v3070_v3, %v4124_v60 }
 0x456   : > { %v4146_v46 = vadd.f32 %v4124_v60, %v1612_v8  ;;  %3298 = vpow2.f32 %v2636_v63  ;;  %v4173_v11 = vadd.f32 %v4124_v60, %v1652_v13 }
 0x457   : > { %v2639_v14 = vmul.f32 -1.442695, %v4143_v7  ;;  %v2647_v0 = vmul.f32 -1.442695, %v4179_v45 }
 0x458   : > { %v2638_v15 = vmul.f32 -1.442695, %v4146_v46  ;;  %v3061_v17 = vpop.f32.mrb[6].mxu0  ;;  %v3073_v18 = vpop.f32.mrb[6].mxu1  ;;  %v2646_v49 = vmul.f32 -1.442695, %v4173_v11 }
 0x459   : > { %3300 = vpow2.f32 %v2639_v14  ;;  %v1622_v19 = vpop.f32.mrb[7].mxu0  ;;  %v1662_v21 = vpop.f32.mrb[7].mxu1  ;;  %v4154_v28 = vadd.f32 %v3061_v17, %v4124_v60 }
 0x45a   : > { %3302 = vpow2.f32 %v2638_v15  ;;  %v4165_v39 = vadd.f32 %v4124_v60, %v1622_v19  ;;  %v4184_v52 = vadd.f32 %v4124_v60, %v1662_v21 }
 0x45b   : > { %v3293_v23 = vpop.eup %3292  ;;  %v2641_v35 = vmul.f32 -1.442695, %v4154_v28 }
 0x45c   : > { %v1720_v24 = vadd.f32 1.0, %v3293_v23  ;;  %v3295_v25 = vpop.eup %3294  ;;  %v2640_v20 = vmul.f32 -1.442695, %v4165_v39 }
 0x45d   : > { %v1719_v27 = vadd.f32 1.0, %v3295_v25 }
 0x45e   : > { %3304 = vrcp.f32 %v1720_v24 }
 0x45f   : > { %v3297_v29 = vpop.eup %3296  ;;  %3306 = vrcp.f32 %v1719_v27 }
 0x460   : > { %v1722_v30 = vadd.f32 1.0, %v3297_v29  ;;  %v3299_v31 = vpop.eup %3298 }
 0x461   : > { %v1721_v34 = vadd.f32 1.0, %v3299_v31 }
 0x462   : > { %3308 = vrcp.f32 %v1722_v30 }
 0x463   : > { %v3301_v36 = vpop.eup %3300  ;;  %3310 = vrcp.f32 %v1721_v34 }
 0x464   : > { %v1724_v38 = vadd.f32 1.0, %v3301_v36  ;;  %v3303_v40 = vpop.eup %3302  ;;  %3312 = vpow2.f32 %v2642_v32 }
 0x465   : > { %v1723_v9 = vadd.f32 1.0, %v3303_v40  ;;  %3314 = vpow2.f32 %v2641_v35 }
 0x466   : > { %3316 = vrcp.f32 %v1724_v38 }
 0x467   : > { %3318 = vrcp.f32 %v1723_v9 }
 0x468   : > { %v3305_v22 = vpop.eup %3304  ;;  %3320 = vpow2.f32 %v2643_v41 }
 0x469   : > { %v3307_v42 = vpop.eup %3306  ;;  %3322 = vpow2.f32 %v2644_v5  ;;  %v1768_v48 = vmul.f32 %v3305_v22, %v4127_v1  ;;  %v4191_v1 = vadd.f32 %v3073_v18, %v4124_v60  ;;  %v2106_v5 = vld [vmem:[%s4398_s9 + $0x8] sm:$0xff]  ;;  %v2108_v22 = vld [vmem:[%s4398_s9 + $0x18] sm:$0xff] }
 0x46a   : > { %v1767_v43 = vmul.f32 %v3307_v42, %v4130_v10  ;;  %3324 = vpow2.f32 %v2640_v20  ;;  %v2648_v10 = vmul.f32 -1.442695, %v4184_v52  ;;  %v2107_v20 = vld [vmem:[%s4398_s9 + $0x10] sm:$0xff] }
 0x46b   : > { %3326 = vpow2.f32 %v2645_v44  ;;  %v2649_v55 = vmul.f32 -1.442695, %v4191_v1  ;;  %v3190_v42 = vpack.c.bf16 %v2108_v22, %v2107_v20  ;;  %v2110_v44 = vld [vmem:[%s4398_s9 + $0x28] sm:$0xff] }
 0x46c   : > { %v3309_v53 = vpop.eup %3308  ;;  %3090 = vmatprep.mubr.msk.f32.mxu1 %vm1477_vm5, %v1767_v43  ;;  %3328 = vpow2.f32 %v2646_v49  ;;  %v2109_v43 = vld [vmem:[%s4398_s9 + $0x20] sm:$0xff]  ;;  %v2112_v49 = vld [vmem:[%s4398_s9 + $0x38] sm:$0xff] }
 0x46d   : > { %v3311_v56 = vpop.eup %3310  ;;  %3091 = vmatmul.mubr.msk.f32.vlgmr.msra.gmra.mrb[8].mxu1 %vm1477_vm5, %v1768_v48  ;;  %v1770_v6 = vmul.f32 %v3309_v53, %v4135_v54  ;;  %3330 = vpow2.f32 %v2647_v0  ;;  %v2111_v48 = vld [vmem:[%s4398_s9 + $0x30] sm:$0xff]  ;;  %v4249_v53 = vld [vmem:[%s4397_s8 + $0x1] ss:$0 sm:$0xff] }
 0x46e   : > { %v3313_v57 = vpop.eup %3312  ;;  %v1769_v61 = vmul.f32 %v3311_v56, %v4138_v59  ;;  %3332 = vpow2.f32 %v2648_v10 }
 0x46f   : > { %v3315_v4 = vpop.eup %3314  ;;  %v1727_v50 = vadd.f32 1.0, %v3313_v57 }
 0x470   : > { %v3317_v12 = vpop.eup %3316  ;;  %3093 = vmatprep.mubr.msk.f32.mxu1 %vm1477_vm5, %v1769_v61  ;;  %v1726_v59 = vadd.f32 1.0, %v3315_v4 }
 0x471   : > { %v3319_v47 = vpop.eup %3318  ;;  %3094 = vmatmul.mubr.msk.f32.gmra.mrb[10].mxu1 %vm1477_vm5, %v1770_v6  ;;  %v1772_v58 = vmul.f32 %v3317_v12, %v4143_v7  ;;  %3334 = vrcp.f32 %v1727_v50 }
 0x472   : > { %v1771_v51 = vmul.f32 %v3319_v47, %v4146_v46  ;;  %v3321_v60 = vpop.eup %3320  ;;  %3336 = vpow2.f32 %v2649_v55 }
 0x473   : > { %v3323_v54 = vpop.eup %3322  ;;  %v1728_v2 = vadd.f32 1.0, %v3321_v60  ;;  %3338 = vrcp.f32 %v1726_v59 }
 0x474   : > { %3096 = vmatprep.mubr.msk.f32.mxu1 %vm1477_vm5, %v1771_v51  ;;  %v3325_v62 = vpop.eup %3324  ;;  %v1729_v8 = vadd.f32 1.0, %v3323_v54 }
 0x475   : > { %3097 = vmatmul.mubr.msk.f32.gmra.mrb[12].mxu1 %vm1477_vm5, %v1772_v58  ;;  %v1725_v63 = vadd.f32 1.0, %v3325_v62  ;;  %v3327_v3 = vpop.eup %3326 }
 0x476   : > { %v3329_v13 = vpop.eup %3328  ;;  %v1730_v46 = vadd.f32 1.0, %v3327_v3 }
 0x477   : > { %3340 = vrcp.f32 %v1725_v63  ;;  %v3331_v7 = vpop.eup %3330  ;;  %v1731_v14 = vadd.f32 1.0, %v3329_v13 }
 0x478   : > { %3342 = vrcp.f32 %v1728_v2  ;;  %v3333_v15 = vpop.eup %3332  ;;  %v1732_v18 = vadd.f32 1.0, %v3331_v7 }
 0x479   : > { %3344 = vrcp.f32 %v1729_v8  ;;  %v1733_v21 = vadd.f32 1.0, %v3333_v15 }
 0x47a   : > { %3346 = vrcp.f32 %v1730_v46 }
 0x47b   : > { %v3335_v17 = vpop.eup %3334  ;;  %3348 = vrcp.f32 %v1731_v14 }
 0x47c   : > { %v3337_v19 = vpop.eup %3336  ;;  %3350 = vrcp.f32 %v1732_v18  ;;  %v1775_v31 = vmul.f32 %v3335_v17, %v4151_v26 }
 0x47d   : > { %v3339_v23 = vpop.eup %3338  ;;  %v1734_v25 = vadd.f32 1.0, %v3337_v19  ;;  %3352 = vrcp.f32 %v1733_v21 }
 0x47e   : > { %v1774_v29 = vmul.f32 %v3339_v23, %v4154_v28 }
 0x47f   : > { %3354 = vrcp.f32 %v1734_v25 }
 0x481   : > { %v3341_v24 = vpop.eup %3340 }
 0x482   : > { %v1773_v27 = vmul.f32 %v3341_v24, %v4165_v39  ;;  %v3343_v30 = vpop.eup %3342 }
 0x483   : > { %v3345_v32 = vpop.eup %3344  ;;  %v1776_v34 = vmul.f32 %v3343_v30, %v4158_v33 }
 0x484   : > { %3099 = vmatprep.mubr.msk.f32.mxu1 %vm1477_vm5, %v1773_v27  ;;  %v3347_v35 = vpop.eup %3346  ;;  %v1777_v36 = vmul.f32 %v3345_v32, %v4162_v37 }
 0x485   : > { %3100 = vmatmul.mubr.msk.f32.gmra.mrb[14].mxu1 %vm1477_vm5, %v1774_v29  ;;  %v3349_v38 = vpop.eup %3348  ;;  %v1778_v26 = vmul.f32 %v3347_v35, %v4169_v16  ;;  %v2105_v16 = vld [vmem:[%s4398_s9] sm:$0xff] }
 0x486   : > { %3102 = vmatprep.mubr.msk.f32.mxu1 %vm1477_vm5, %v1775_v31  ;;  %v3351_v28 = vpop.eup %3350  ;;  %v1779_v39 = vmul.f32 %v3349_v38, %v4173_v11  ;;  %v3186_v11 = vpack.c.bf16 %v2106_v5, %v2105_v16 }
 0x487   : > { %v3353_v40 = vpop.eup %3352  ;;  %v1780_v33 = vmul.f32 %v3351_v28, %v4179_v45  ;;  %v3194_v45 = vpack.c.bf16 %v2110_v44, %v2109_v43 }
 0x488   : > { %v1781_v37 = vmul.f32 %v3353_v40, %v4184_v52  ;;  %3187 = vmatprep.subr.bf16.mxu0 %v3186_v11  ;;  %v3198_v52 = vpack.c.bf16 %v2112_v49, %v2111_v48 }
 0x489   : > { %3103 = vmatmul.mubr.msk.f32.gmra.mrb[16].mxu1 %vm1477_vm5, %v1776_v34  ;;  %v3355_v41 = vpop.eup %3354  ;;  %3189 = vmatpush3.bf16.msra.mxu0 %v3186_v11 }
 0x48a   : > { %3105 = vmatprep.mubr.msk.f32.mxu1 %vm1477_vm5, %v1777_v36  ;;  %v1782_v9 = vmul.f32 %v3355_v41, %v4191_v1  ;;  %3191 = vmatprep.subr.bf16.mxu0 %v3190_v42 }
 0x48d   : > { %3106 = vmatmul.mubr.msk.f32.gmra.mrb[18].mxu1 %vm1477_vm5, %v1778_v26  ;;  %3193 = vmatpush3.bf16.msra.mxu0 %v3190_v42 }
 0x48e   : > { %3108 = vmatprep.mubr.msk.f32.mxu1 %vm1477_vm5, %v1779_v39  ;;  %3195 = vmatprep.subr.bf16.mxu0 %v3194_v45 }
 0x491   : > { %3109 = vmatmul.mubr.msk.f32.gmra.mrb[20].mxu1 %vm1477_vm5, %v1780_v33  ;;  %3197 = vmatpush3.bf16.msra.mxu0 %v3194_v45 }
 0x492   : > { %3111 = vmatprep.mubr.msk.f32.mxu1 %vm1477_vm5, %v1781_v37  ;;  %3199 = vmatprep.subr.bf16.mxu0 %v3198_v52 }
 0x495   : > { %3112 = vmatmul.mubr.msk.f32.gmra.mrb[22].mxu1 %vm1477_vm5, %v1782_v9  ;;  %3201 = vmatpush3.bf16.msra.mxu0 %v3198_v52 }
 0x540   : > { %v3092_v56 = vpop.f32.mrb[8].mxu1 }
 0x541   : > { %v1920_v57 = vadd.f32 %v3092_v56, %v4249_v53  ;;  %v1914_v61 = vpop.f32.mrb[9].mxu1 }
 0x542   : > { %v1915_v0 = vadd.f32 %v4249_v53, %v1914_v61 }
 0x543   : > { %v2677_v1 = vmul.f32 -1.442695, %v1920_v57 }
 0x544   : > { %v2676_v4 = vmul.f32 -1.442695, %v1915_v0  ;;  %v3095_v6 = vpop.f32.mrb[10].mxu1 }
 0x545   : > { %3356 = vpow2.f32 %v2677_v1  ;;  %v1930_v10 = vadd.f32 %v3095_v6, %v4249_v53  ;;  %v1924_v12 = vpop.f32.mrb[11].mxu1 }
 0x546   : > { %3358 = vpow2.f32 %v2676_v4  ;;  %v1925_v47 = vadd.f32 %v4249_v53, %v1924_v12 }
 0x547   : > { %v2679_v50 = vmul.f32 -1.442695, %v1930_v10 }
 0x548   : > { %v2678_v51 = vmul.f32 -1.442695, %v1925_v47  ;;  %v3098_v55 = vpop.f32.mrb[12].mxu1 }
 0x549   : > { %3360 = vpow2.f32 %v2679_v50  ;;  %v4256_v60 = vadd.f32 %v3098_v55, %v4249_v53  ;;  %v1934_v58 = vpop.f32.mrb[13].mxu1 }
 0x54a   : > { %3362 = vpow2.f32 %v2678_v51  ;;  %v1935_v59 = vadd.f32 %v4249_v53, %v1934_v58 }
 0x54b   : > { %v2681_v54 = vmul.f32 -1.442695, %v4256_v60 }
 0x54c   : > { %v2680_v62 = vmul.f32 -1.442695, %v1935_v59 }
 0x54d   : > { %3364 = vpow2.f32 %v2681_v54 }
 0x54e   : > { %3366 = vpow2.f32 %v2680_v62 }
 0x54f   : > { %v3357_v63 = vpop.eup %3356 }
 0x550   : > { %v3359_v2 = vpop.eup %3358  ;;  %v2042_v3 = vadd.f32 1.0, %v3357_v63 }
 0x551   : > { %v2041_v8 = vadd.f32 1.0, %v3359_v2 }
 0x552   : > { %3368 = vrcp.f32 %v2042_v3 }
 0x553   : > { %v3361_v13 = vpop.eup %3360  ;;  %3370 = vrcp.f32 %v2041_v8 }
 0x554   : > { %v3363_v46 = vpop.eup %3362  ;;  %v2044_v7 = vadd.f32 1.0, %v3361_v13 }
 0x555   : > { %v2043_v14 = vadd.f32 1.0, %v3363_v46 }
 0x556   : > { %3372 = vrcp.f32 %v2044_v7 }
 0x557   : > { %v3365_v15 = vpop.eup %3364  ;;  %3374 = vrcp.f32 %v2043_v14 }
 0x558   : > { %v3367_v17 = vpop.eup %3366  ;;  %v2046_v18 = vadd.f32 1.0, %v3365_v15  ;;  %v3101_v21 = vpop.f32.mrb[14].mxu1 }
 0x559   : > { %v2045_v19 = vadd.f32 1.0, %v3367_v17  ;;  %v4261_v23 = vadd.f32 %v3101_v21, %v4249_v53  ;;  %v1944_v24 = vpop.f32.mrb[15].mxu1 }
 0x55a   : > { %3376 = vrcp.f32 %v2046_v18  ;;  %v4264_v25 = vadd.f32 %v4249_v53, %v1944_v24 }
 0x55b   : > { %3378 = vrcp.f32 %v2045_v19  ;;  %v2683_v29 = vmul.f32 -1.442695, %v4261_v23 }
 0x55c   : > { %v3369_v27 = vpop.eup %3368  ;;  %v2682_v31 = vmul.f32 -1.442695, %v4264_v25  ;;  %v3104_v32 = vpop.f32.mrb[16].mxu1 }
 0x55d   : > { %v3371_v30 = vpop.eup %3370  ;;  %3380 = vpow2.f32 %v2683_v29  ;;  %v4269_v35 = vadd.f32 %v3104_v32, %v4249_v53  ;;  %v1954_v36 = vpop.f32.mrb[17].mxu1  ;;  %v2090_v38 = vmul.f32 %v3369_v27, %v1920_v57 }
 0x55e   : > { %v2089_v34 = vmul.f32 %v3371_v30, %v1915_v0  ;;  %3382 = vpow2.f32 %v2682_v31  ;;  %v4272_v26 = vadd.f32 %v4249_v53, %v1954_v36 }
 0x55f   : > { %v2685_v39 = vmul.f32 -1.442695, %v4269_v35 }
 0x560   : > { %v3373_v28 = vpop.eup %3372  ;;  %3130 = vmatprep.mubr.msk.f32.mxu0 %vm1477_vm5, %v2089_v34  ;;  %v2684_v33 = vmul.f32 -1.442695, %v4272_v26  ;;  %v3107_v41 = vpop.f32.mrb[18].mxu1 }
 0x561   : > { %v3375_v40 = vpop.eup %3374  ;;  %3131 = vmatmul.mubr.msk.f32.vlgmr.msra.gmra.mrb[8].mxu0 %vm1477_vm5, %v2090_v38  ;;  %3384 = vpow2.f32 %v2685_v39  ;;  %v4279_v9 = vadd.f32 %v3107_v41, %v4249_v53  ;;  %v1964_v16 = vpop.f32.mrb[19].mxu1  ;;  %v2092_v5 = vmul.f32 %v3373_v28, %v1930_v10 }
 0x562   : > { %v2091_v37 = vmul.f32 %v3375_v40, %v1925_v47  ;;  %3386 = vpow2.f32 %v2684_v33  ;;  %v4282_v11 = vadd.f32 %v4249_v53, %v1964_v16 }
 0x563   : > { %v2687_v22 = vmul.f32 -1.442695, %v4279_v9 }
 0x564   : > { %v3377_v20 = vpop.eup %3376  ;;  %3133 = vmatprep.mubr.msk.f32.mxu0 %vm1477_vm5, %v2091_v37  ;;  %v2686_v43 = vmul.f32 -1.442695, %v4282_v11  ;;  %v3110_v44 = vpop.f32.mrb[20].mxu1 }
 0x565   : > { %v3379_v42 = vpop.eup %3378  ;;  %3134 = vmatmul.mubr.msk.f32.gmra.mrb[10].mxu0 %vm1477_vm5, %v2092_v5  ;;  %3388 = vpow2.f32 %v2687_v22  ;;  %v4289_v48 = vadd.f32 %v3110_v44, %v4249_v53  ;;  %v1974_v49 = vpop.f32.mrb[21].mxu1  ;;  %v2094_v52 = vmul.f32 %v3377_v20, %v4256_v60 }
 0x566   : > { %v2093_v45 = vmul.f32 %v3379_v42, %v1935_v59  ;;  %3390 = vpow2.f32 %v2686_v43  ;;  %v4293_v56 = vadd.f32 %v4249_v53, %v1974_v49 }
 0x567   : > { %v3381_v57 = vpop.eup %3380  ;;  %v2689_v61 = vmul.f32 -1.442695, %v4289_v48 }
 0x568   : > { %3136 = vmatprep.mubr.msk.f32.mxu0 %vm1477_vm5, %v2093_v45  ;;  %v3383_v0 = vpop.eup %3382  ;;  %v2048_v1 = vadd.f32 1.0, %v3381_v57  ;;  %v2688_v4 = vmul.f32 -1.442695, %v4293_v56  ;;  %v3113_v6 = vpop.f32.mrb[22].mxu1 }
 0x569   : > { %3137 = vmatmul.mubr.msk.f32.gmra.mrb[12].mxu0 %vm1477_vm5, %v2094_v52  ;;  %v2047_v10 = vadd.f32 1.0, %v3383_v0  ;;  %3392 = vpow2.f32 %v2689_v61  ;;  %v1990_v12 = vadd.f32 %v3113_v6, %v4249_v53  ;;  %v1984_v47 = vpop.f32.mrb[23].mxu1 }
 0x56a   : > { %3394 = vrcp.f32 %v2048_v1  ;;  %v1985_v50 = vadd.f32 %v4249_v53, %v1984_v47 }
 0x56b   : > { %v3385_v51 = vpop.eup %3384  ;;  %3396 = vrcp.f32 %v2047_v10  ;;  %v2691_v55 = vmul.f32 -1.442695, %v1990_v12 }
 0x56c   : > { %v3387_v60 = vpop.eup %3386  ;;  %v2050_v58 = vadd.f32 1.0, %v3385_v51  ;;  %3398 = vpow2.f32 %v2688_v4  ;;  %v2690_v59 = vmul.f32 -1.442695, %v1985_v50 }
 0x56d   : > { %v2049_v54 = vadd.f32 1.0, %v3387_v60  ;;  %3400 = vpow2.f32 %v2691_v55 }
 0x56e   : > { %3402 = vrcp.f32 %v2050_v58 }
 0x56f   : > { %v3389_v62 = vpop.eup %3388  ;;  %3404 = vrcp.f32 %v2049_v54 }
 0x570   : > { %v3391_v63 = vpop.eup %3390  ;;  %v2052_v2 = vadd.f32 1.0, %v3389_v62  ;;  %3406 = vpow2.f32 %v2690_v59 }
 0x571   : > { %v2051_v3 = vadd.f32 1.0, %v3391_v63 }
 0x572   : > { %3408 = vrcp.f32 %v2052_v2 }
 0x573   : > { %v3393_v8 = vpop.eup %3392  ;;  %3410 = vrcp.f32 %v2051_v3 }
 0x574   : > { %v3395_v53 = vpop.eup %3394  ;;  %v2054_v13 = vadd.f32 1.0, %v3393_v8 }
 0x575   : > { %v3397_v46 = vpop.eup %3396  ;;  %v2096_v17 = vmul.f32 %v3395_v53, %v4261_v23 }
 0x576   : > { %v3399_v7 = vpop.eup %3398  ;;  %v2095_v14 = vmul.f32 %v3397_v46, %v4264_v25  ;;  %3412 = vrcp.f32 %v2054_v13 }
 0x577   : > { %v3401_v15 = vpop.eup %3400  ;;  %v2053_v18 = vadd.f32 1.0, %v3399_v7 }
 0x578   : > { %v3403_v19 = vpop.eup %3402  ;;  %v2056_v21 = vadd.f32 1.0, %v3401_v15  ;;  %3139 = vmatprep.mubr.msk.f32.mxu0 %vm1477_vm5, %v2095_v14 }
 0x579   : > { %v3405_v24 = vpop.eup %3404  ;;  %3414 = vrcp.f32 %v2053_v18  ;;  %3140 = vmatmul.mubr.msk.f32.gmra.mrb[14].mxu0 %vm1477_vm5, %v2096_v17  ;;  %v2098_v30 = vmul.f32 %v3403_v19, %v4269_v35 }
 0x57a   : > { %v3407_v27 = vpop.eup %3406  ;;  %v2097_v29 = vmul.f32 %v3405_v24, %v4272_v26  ;;  %3416 = vrcp.f32 %v2056_v21 }
 0x57b   : > { %v2055_v31 = vadd.f32 1.0, %v3407_v27 }
 0x57c   : > { %v3409_v25 = vpop.eup %3408  ;;  %3142 = vmatprep.mubr.msk.f32.mxu0 %vm1477_vm5, %v2097_v29 }
 0x57d   : > { %v3411_v23 = vpop.eup %3410  ;;  %3418 = vrcp.f32 %v2055_v31  ;;  %3143 = vmatmul.mubr.msk.f32.gmra.mrb[16].mxu0 %vm1477_vm5, %v2098_v30  ;;  %v2100_v34 = vmul.f32 %v3409_v25, %v4279_v9 }
 0x57e   : > { %v2099_v32 = vmul.f32 %v3411_v23, %v4282_v11 }
 0x580   : > { %3145 = vmatprep.mubr.msk.f32.mxu0 %vm1477_vm5, %v2099_v32  ;;  %v3413_v36 = vpop.eup %3412 }
 0x581   : > { %3146 = vmatmul.mubr.msk.f32.gmra.mrb[18].mxu0 %vm1477_vm5, %v2100_v34  ;;  %v2102_v26 = vmul.f32 %v3413_v36, %v4289_v48 }
 0x583   : > { %v3415_v35 = vpop.eup %3414 }
 0x584   : > { %v2101_v38 = vmul.f32 %v3415_v35, %v4293_v56  ;;  %v3417_v28 = vpop.eup %3416 }
 0x585   : > { %v2104_v33 = vmul.f32 %v3417_v28, %v1990_v12 }
 0x586   : > { %3148 = vmatprep.mubr.msk.f32.mxu0 %vm1477_vm5, %v2101_v38 }
 0x587   : > { %v3419_v39 = vpop.eup %3418  ;;  %3149 = vmatmul.mubr.msk.f32.gmra.mrb[20].mxu0 %vm1477_vm5, %v2102_v26 }
 0x588   : > { %v2103_v40 = vmul.f32 %v3419_v39, %v1985_v50 }
 0x58a   : > { %3151 = vmatprep.mubr.msk.f32.mxu0 %vm1477_vm5, %v2103_v40 }
 0x58b   : > { %3152 = vmatmul.mubr.msk.f32.gmra.mrb[22].mxu0 %vm1477_vm5, %v2104_v33 }
 0x634   : > { %v3132_v41 = vpop.f32.mrb[8].mxu0 }
 0x635   : > { %v2227_v37 = vpop.f32.mrb[9].mxu0 }
 0x636   : > { %v2749_v9 = vpack.c.bf16 %v3132_v41, %v2227_v37 }
 0x638   : > { %2750 = vst [vmem:[%s3714_s23] sm:$0xff] %v2749_v9   ;;  %v3135_v16 = vpop.f32.mrb[10].mxu0 }
 0x639   : > { %v2237_v5 = vpop.f32.mrb[11].mxu0 }
 0x63a   : > { %v2754_v11 = vpack.c.bf16 %v3135_v16, %v2237_v5 }
 0x63c   : > { %2786 = vst [vmem:[%s3714_s23 + $0x8] sm:$0xff] %v2754_v11   ;;  %v3138_v20 = vpop.f32.mrb[12].mxu0 }
 0x63d   : > { %v2247_v22 = vpop.f32.mrb[13].mxu0 }
 0x63e   : > { %v2759_v42 = vpack.c.bf16 %v3138_v20, %v2247_v22 }
 0x640   : > { %2787 = vst [vmem:[%s3714_s23 + $0x10] sm:$0xff] %v2759_v42  }
 0x64c   : > { %v3141_v43 = vpop.f32.mrb[14].mxu0 }
 0x64d   : > { %v2257_v44 = vpop.f32.mrb[15].mxu0 }
 0x64e   : > { %v2764_v45 = vpack.c.bf16 %v3141_v43, %v2257_v44 }
 0x650   : > { %2788 = vst [vmem:[%s3714_s23 + $0x18] sm:$0xff] %v2764_v45   ;;  %v3144_v48 = vpop.f32.mrb[16].mxu0 }
 0x651   : > { %v2267_v49 = vpop.f32.mrb[17].mxu0 }
 0x652   : > { %v2769_v52 = vpack.c.bf16 %v3144_v48, %v2267_v49 }
 0x654   : > { %2789 = vst [vmem:[%s3714_s23 + $0x20] sm:$0xff] %v2769_v52   ;;  %v3147_v56 = vpop.f32.mrb[18].mxu0 }
 0x655   : > { %v2277_v57 = vpop.f32.mrb[19].mxu0 }
 0x656   : > { %v2774_v61 = vpack.c.bf16 %v3147_v56, %v2277_v57 }
 0x658   : > { %2790 = vst [vmem:[%s3714_s23 + $0x28] sm:$0xff] %v2774_v61  }
 0x65a   : > { %v3150_v0 = vpop.f32.mrb[20].mxu0 }
 0x65b   : > { %v2287_v1 = vpop.f32.mrb[21].mxu0 }
 0x65c   : > { %v2779_v4 = vpack.c.bf16 %v3150_v0, %v2287_v1 }
 0x65e   : > { %2791 = vst [vmem:[%s3714_s23 + $0x30] sm:$0xff] %v2779_v4   ;;  %v3153_v6 = vpop.f32.mrb[22].mxu0 }
 0x65f   : > { %v2297_v10 = vpop.f32.mrb[23].mxu0 }
 0x660   : > { %v2784_v12 = vpack.c.bf16 %v3153_v6, %v2297_v10 }
 0x662   : > { %2792 = vst [vmem:[%s3714_s23 + $0x38] sm:$0xff] %v2784_v12  }
 0x663 PF: > { %s2745_s17 = sshll.u32 %s3528_s25, 10  ;;  %s2400_s1 = sshll.u32 %s3714_s23, 4  ;;  %s4334_s1 = int_to_ptr.vmem [resolvable:$true] %s2400_s1 }
 0x664   : > { %s4331_s21 = scalar_lea.hbm %s4399_s10, %s2745_s17  ;;  %s4455_s14 = sand.u32 1, %s3516_s22  }
 0x665   : > { %s4338_s18 = scalar_lea.sflag [#allocation7], %s4455_s14  ;;  %s3444_s24 = scalar_lea.vmem %s4334_s1, 1024 }
 0x666   : > { %p3445_p8 = scmp.ne.s32.totalorder %s4334_s1, %s3444_s24  ;;  %s3546_s25 = smov [#allocation6]  }
 0x667   : > { %s3448_s19 = sshll.u32 %s3546_s25, 4  ;;  %s3449_s19 = int_to_ptr.vmem [resolvable:$false] %s3448_s19 }
 0x668   : > { %p3446_p9 = pnand %p3445_p8, %p3659_p13  ;;  %s3450_s29 = scalar_lea.vmem %s3449_s19, 2048 }
 0x669   : > { %p3451_p11 = scmp.lt.s32.totalorder %s4334_s1, %s3449_s19  ;;  %p3452_p12 = scmp.lt.s32.totalorder %s3450_s29, %s3444_s24 }
 0x66a   : > { %p3447_p10 = pneg %p3446_p9 }
 0x66b   : > { %p3453_p0 = por %p3452_p12, %p3451_p11 }
 0x66d   : > { %p3454_p1 = pnand %p3453_p0, %p3447_p10 }
 0x66f   : > { %3457 = shalt.err (!%p3454_p1)
}
 0x670   : > { %s3458_s23 = scalar_lea.hbm %s4331_s21, 1024  ;;  %s3462_s30 = scalar_lea.hbm %s4399_s10, 2048 }
 0x671   : > { %p3459_p2 = scmp.ne.s32.totalorder %s4331_s21, %s3458_s23  ;;  %p3463_p6 = scmp.lt.u32.totalorder %s4331_s21, %s4399_s10 }
 0x672   : > { %p3464_p7 = scmp.lt.u32.totalorder %s3462_s30, %s3458_s23  ;;  %p3466_p9 = scmp.lt.u32.totalorder %s3458_s23, %s4331_s21 }
 0x673   : > { %p3460_p3 = pnand %p3459_p2, %p3659_p13 }
 0x674   : > { %p3465_p8 = por %p3464_p7, %p3463_p6 }
 0x675   : > { %p3461_p4 = pneg %p3460_p3 }
 0x676   : > { %p3467_p10 = por %p3466_p9, %p3465_p8 }
 0x678   : > { %p3468_p11 = pnand %p3467_p10, %p3461_p4 }
 0x67a   : > { %3471 = shalt.err (!%p3468_p11)
}
 0x67b   : > { %s3547_s12 = smov 64   ;;  %s3548_s26 = smov 4  }
 0x67c   : > { %3212 = dma.vmem_to_hbm [thread:$0]  (%p3659_p13), %s4334_s1, 1024, %s4331_s21, %s4338_s18, %s3547_s12, %s3547_s12, %s3548_s26  }
 0x67d PF: > { %s4456_s17 = sld [smem:[#allocation10_spill]]  ;;  %p3218_p12 = scmp.ge.s32.totalorder %s3540_s28, 2 }
 0x67f   : > { %p3215_p0 = pnand %p3218_p12, %p3669_p5 }
 0x683   : > { %s2415_s20 = sand.u32 1, %s4456_s17  }
 0x684   : > { %s2416_s14 = scalar_lea.sflag [#allocation7], %s2415_s20 }
 0x685   : > { %3507 = dma.done.wait (!%p3215_p0), %s2416_s14, 1024  }
 0x686   : > { %3509 = vsyncadd (!%p3215_p0), %s2416_s14, 4294966272  ;;  %s33_s28 = sadd.s32 1, %s3540_s28   ;;  %s4458_s24 = sld [smem:[#allocation11_spill]] }
 0x687   : > { %p30_p1 = scmp.ge.s32.totalorder %s33_s28, 6   ;;  %s4459_s23 = sld [smem:[#allocation17_spill]] }
 0x688   : > { %s4460_s25 = sld [smem:[#allocation12_spill]]  ;;  %s4461_s13 = sld [smem:[#allocation13_spill]] }
 0x689   : > { %s4462_s26 = sld [smem:[#allocation14_spill]]  ;;  %s4463_s27 = sld [smem:[#allocation15_spill]] }
 0x68a   : > { %s4464_s1 = smov %s3516_s22  ;;  %32 = sbr.rel (!%p30_p1) target bundleno = 30 (0x1e), region = 107 }
 0x68c   : > { %s4465_s22 = smov %s4458_s24 }
 0x68e   : > { %s4466_s24 = smov %s4460_s25  ;;  %s4467_s25 = smov %s4461_s13 }
 0x691   :  { %2421 = vsyncpa [#allocation7], 1 }
 0x692   :  { %2423 = vsyncpa [#allocation7 + $0x1], 1 }

</bundles_post_ra>
